<compile_context>
chip_gen: v6e
topology: v6e:2x2x1
jax: 0.10.0
libtpu: 0.0.40
codegen_flags: <defaults>
</compile_context>

<pallas_src>
import functools

import jax
import jax.numpy as jnp
from jax import lax
from jax.experimental import pallas as pl
from jax.experimental.pallas import tpu as pltpu


def _round_up(x, m):
    return (x + m - 1) // m * m


def _default_row_tile():
    # v5e's MXU is 128 rows wide; v6e/v7x (256x256 MXU) like 256-row tiles.
    try:
        kind = jax.devices()[0].device_kind.lower()
    except Exception:
        return 128
    return 128 if "v5" in kind else 256


def _generator_kernel(x_ref, w1_ref, b1_ref, w2_ref, b2_ref, o_ref,
                      h_ref, m_ref, l_ref, *, tn, voc_size, voc_pad):
    # x_ref:  (tm, d_model)        row tile (resident across vocab tiles)
    # w1_ref: (d_model, voc_pad)   full W1, single-buffered
    # b1_ref: (1, voc_pad)
    # w2_ref: (voc_pad, tn)        streamed vocab tile of W2
    # b2_ref: (1, tn)
    # o_ref:  (tm, voc_pad)        resident output block (log-probs)
    # h_ref:  (tm, voc_pad)  f32 scratch: relu(x W1 + b1), computed at j == 0
    # m_ref, l_ref: (tm, 1)  f32 scratch: online logsumexp state
    j = pl.program_id(1)
    nj = pl.num_programs(1)

    @pl.when(j == 0)
    def _():
        h = jnp.dot(x_ref[...], w1_ref[...], preferred_element_type=jnp.float32)
        h = jnp.maximum(h + b1_ref[...], 0.0)
        # dropout == identity in eval mode
        h_ref[...] = h
        m_ref[...] = jnp.full_like(m_ref, -jnp.inf)
        l_ref[...] = jnp.zeros_like(l_ref)

    # Second linear on one vocab tile (the dominant voc^2 GEMM, streamed).
    y = jnp.dot(h_ref[...], w2_ref[...], preferred_element_type=jnp.float32)
    y = y + b2_ref[...]

    if voc_pad != voc_size:  # static: mask padded vocab columns out of the LSE
        col = j * tn + lax.broadcasted_iota(jnp.int32, y.shape, 1)
        y = jnp.where(col < voc_size, y, -jnp.inf)

    # Stash raw logits for this vocab tile into the resident output block.
    o_ref[:, pl.ds(pl.multiple_of(j * tn, tn), tn)] = y

    # Online logsumexp accumulation (exp on EUP, row-reduce on XLU).
    m_prev = m_ref[...]
    m_new = jnp.maximum(m_prev, jnp.max(y, axis=-1, keepdims=True))
    l_ref[...] = (l_ref[...] * jnp.exp(m_prev - m_new)
                  + jnp.sum(jnp.exp(y - m_new), axis=-1, keepdims=True))
    m_ref[...] = m_new

    # Last vocab tile: normalize the whole resident row block in place.
    @pl.when(j == nj - 1)
    def _():
        lse = m_ref[...] + jnp.log(l_ref[...])
        o_ref[...] = o_ref[...] - lse


@functools.partial(jax.jit, static_argnames=("tm", "tn"))
def _generator_forward_impl(x, w1, b1, w2, b2, *, tm, tn):
    B, S, d_model = x.shape
    voc_size = w1.shape[1]
    N = B * S

    n_pad = _round_up(N, tm)
    voc_pad = _round_up(voc_size, tn)
    pad_v = voc_pad - voc_size

    x_flat = x.reshape(N, d_model)
    if n_pad != N:
        x_flat = jnp.pad(x_flat, ((0, n_pad - N), (0, 0)))

    w1_p = jnp.pad(w1, ((0, 0), (0, pad_v))) if pad_v else w1
    b1_p = jnp.pad(b1, ((0, pad_v),)) if pad_v else b1
    w2_p = jnp.pad(w2, ((0, pad_v), (0, pad_v))) if pad_v else w2
    b2_p = jnp.pad(b2, ((0, pad_v),)) if pad_v else b2

    b1_2d = b1_p.reshape(1, voc_pad)
    b2_2d = b2_p.reshape(1, voc_pad)

    n_row_tiles = n_pad // tm
    n_voc_tiles = voc_pad // tn

    kernel = functools.partial(_generator_kernel, tn=tn,
                               voc_size=voc_size, voc_pad=voc_pad)

    cost = pl.CostEstimate(
        flops=int(2 * n_pad * d_model * voc_pad + 2 * n_pad * voc_pad * voc_pad),
        transcendentals=int(n_pad * voc_pad),
        bytes_accessed=int(4 * (x_flat.size + w1_p.size + w2_p.size
                                + b1_2d.size + b2_2d.size + n_pad * voc_pad)),
    )

    out_flat = pl.pallas_call(
        kernel,
        out_shape=jax.ShapeDtypeStruct((n_pad, voc_pad), jnp.float32),
        grid_spec=pltpu.PrefetchScalarGridSpec(
            num_scalar_prefetch=0,
            grid=(n_row_tiles, n_voc_tiles),
            in_specs=[
                # x row tile: resident across vocab tiles
                pl.BlockSpec((tm, d_model), lambda i, j: (i, 0)),
                # W1 / b1: constant block index -> single buffered
                pl.BlockSpec((d_model, voc_pad), lambda i, j: (0, 0),
                             pipeline_mode=pl.Buffered(1)),
                pl.BlockSpec((1, voc_pad), lambda i, j: (0, 0),
                             pipeline_mode=pl.Buffered(1)),
                # W2 / b2: streamed over the vocab axis (default double buffer)
                pl.BlockSpec((voc_pad, tn), lambda i, j: (0, j)),
                pl.BlockSpec((1, tn), lambda i, j: (0, j)),
            ],
            out_specs=pl.BlockSpec((tm, voc_pad), lambda i, j: (i, 0)),
            scratch_shapes=[
                pltpu.VMEM((tm, voc_pad), jnp.float32),  # h = relu(xW1+b1)
                pltpu.VMEM((tm, 1), jnp.float32),        # running max
                pltpu.VMEM((tm, 1), jnp.float32),        # running sum
            ],
        ),
        compiler_params=pltpu.CompilerParams(
            dimension_semantics=("parallel", "arbitrary"),
            vmem_limit_bytes=48 * 1024 * 1024,
        ),
        cost_estimate=cost,
    )(x_flat, w1_p, b1_2d, w2_p, b2_2d)

    return out_flat[:N, :voc_size].reshape(B, S, voc_size)


def generator_forward(x, w1, b1, w2, b2, *, tm=None, tn=None):
    """x: (B, S, d_model) f32; w1: (d_model, voc); w2: (voc, voc) -> log-probs."""
    voc_size = w1.shape[1]
    if tm is None:
        tm = _default_row_tile()
    if tn is None:
        tn = min(512, _round_up(voc_size, 128))
    return _generator_forward_impl(x, w1, b1, w2, b2, tm=tm, tn=tn)


def _reference(x, w1, b1, w2, b2):
    h = jnp.maximum(x @ w1 + b1, 0.0)
    y = h @ w2 + b2
    return jax.nn.log_softmax(y, axis=-1)


if __name__ == "__main__":
    # Small shapes consistent with the module: batch=2, seq=8, d_model=32, voc_size=128
    B, S, d_model, voc_size = 2, 8, 32, 128

    key = jax.random.PRNGKey(0)
    kx, k1, k2, k3, k4 = jax.random.split(key, 5)

    x = jax.random.normal(kx, (B, S, d_model), dtype=jnp.float32)

    # Deterministic parameter init (nn.Linear-style uniform bounds).
    bound1 = 1.0 / (d_model ** 0.5)
    w1 = jax.random.uniform(k1, (d_model, voc_size), jnp.float32, -bound1, bound1)
    b1 = jax.random.uniform(k2, (voc_size,), jnp.float32, -bound1, bound1)

    bound2 = 1.0 / (voc_size ** 0.5)
    w2 = jax.random.uniform(k3, (voc_size, voc_size), jnp.float32, -bound2, bound2)
    b2 = jax.random.uniform(k4, (voc_size,), jnp.float32, -bound2, bound2)

    out = generator_forward(x, w1, b1, w2, b2)
    out = jax.block_until_ready(out)

    ref = _reference(x, w1, b1, w2, b2)
    assert out.shape == (B, S, voc_size)
    assert jnp.allclose(out, ref, atol=1e-4, rtol=1e-4), "mismatch vs reference"

    print("KERNEL_OK")
</pallas_src>

<mosaic_0001>
module attributes {stable_mosaic.version = 11 : i64} {
  func.func @_generator_kernel(%arg0: i32, %arg1: i32, %arg2: memref<256x32xf32, #tpu.memory_space<vmem>>, %arg3: memref<32x128xf32, #tpu.memory_space<vmem>>, %arg4: memref<1x128xf32, #tpu.memory_space<vmem>>, %arg5: memref<128x128xf32, #tpu.memory_space<vmem>>, %arg6: memref<1x128xf32, #tpu.memory_space<vmem>>, %arg7: memref<256x128xf32, #tpu.memory_space<vmem>>, %arg8: memref<256x128xf32, #tpu.memory_space<vmem>>, %arg9: memref<256x1xf32, #tpu.memory_space<vmem>>, %arg10: memref<256x1xf32, #tpu.memory_space<vmem>>) attributes {dimension_semantics = [#tpu.dimension_semantics<parallel>, #tpu.dimension_semantics<arbitrary>], iteration_bounds = array<i64: 1, 1>, scalar_prefetch = 0 : i64, scratch_operands = 3 : i64, tpu.core_type = #tpu.core_type<tc>, window_params = [{transform_indices = @transform_0, window_bounds = array<i64: 256, 32>}, {pipeline_mode = #tpu.pipeline_mode<synchronous>, transform_indices = @transform_1, window_bounds = array<i64: 32, 128>}, {pipeline_mode = #tpu.pipeline_mode<synchronous>, transform_indices = @transform_2, window_bounds = array<i64: 1, 128>}, {transform_indices = @transform_3, window_bounds = array<i64: 128, 128>}, {transform_indices = @transform_4, window_bounds = array<i64: 1, 128>}, {transform_indices = @transform_5, window_bounds = array<i64: 256, 128>}]} {
    %c0_i32 = arith.constant 0 : i32
    %0 = arith.cmpi eq, %arg1, %c0_i32 : i32
    %1 = arith.extui %0 : i1 to i32
    %c0_i32_0 = arith.constant 0 : i32
    %2 = arith.cmpi ne, %1, %c0_i32_0 : i32
    scf.if %2 {
      %c0_19 = arith.constant 0 : index
      %c0_20 = arith.constant 0 : index
      %32 = vector.load %arg2[%c0_19, %c0_20] : memref<256x32xf32, #tpu.memory_space<vmem>>, vector<256x32xf32>
      %c0_21 = arith.constant 0 : index
      %c0_22 = arith.constant 0 : index
      %33 = vector.load %arg3[%c0_21, %c0_22] : memref<32x128xf32, #tpu.memory_space<vmem>>, vector<32x128xf32>
      %cst_23 = arith.constant dense<0.000000e+00> : vector<256x128xf32>
      %34 = tpu.matmul %32, %33, %cst_23 {dimension_numbers = #tpu.dot_dimension_numbers<[1], [0], [0], [1], [0, 0, 1, 1], [], []>} : vector<256x32xf32>, vector<32x128xf32>, vector<256x128xf32> -> vector<256x128xf32>
      %c0_24 = arith.constant 0 : index
      %c0_25 = arith.constant 0 : index
      %35 = vector.load %arg4[%c0_24, %c0_25] : memref<1x128xf32, #tpu.memory_space<vmem>>, vector<1x128xf32>
      %36 = vector.broadcast %35 : vector<1x128xf32> to vector<256x128xf32>
      %37 = arith.addf %34, %36 : vector<256x128xf32>
      %cst_26 = arith.constant 0.000000e+00 : f32
      %38 = vector.broadcast %cst_26 : f32 to vector<256x128xf32>
      %39 = arith.maximumf %37, %38 : vector<256x128xf32>
      %c0_27 = arith.constant 0 : index
      %c0_28 = arith.constant 0 : index
      %40 = vector.load %arg8[%c0_27, %c0_28] : memref<256x128xf32, #tpu.memory_space<vmem>>, vector<256x128xf32>
      tpu.vector_store %arg8[%c0_27, %c0_28], %39 {strides = array<i32>} : memref<256x128xf32, #tpu.memory_space<vmem>>, vector<256x128xf32>,
      %cst_29 = arith.constant 0xFF800000 : f32
      %41 = vector.broadcast %cst_29 : f32 to vector<256x1xf32>
      %c0_30 = arith.constant 0 : index
      %c0_31 = arith.constant 0 : index
      %42 = vector.load %arg9[%c0_30, %c0_31] : memref<256x1xf32, #tpu.memory_space<vmem>>, vector<256x1xf32>
      tpu.vector_store %arg9[%c0_30, %c0_31], %41 {strides = array<i32>} : memref<256x1xf32, #tpu.memory_space<vmem>>, vector<256x1xf32>,
      %cst_32 = arith.constant 0.000000e+00 : f32
      %43 = vector.broadcast %cst_32 : f32 to vector<256x1xf32>
      %c0_33 = arith.constant 0 : index
      %c0_34 = arith.constant 0 : index
      %44 = vector.load %arg10[%c0_33, %c0_34] : memref<256x1xf32, #tpu.memory_space<vmem>>, vector<256x1xf32>
      tpu.vector_store %arg10[%c0_33, %c0_34], %43 {strides = array<i32>} : memref<256x1xf32, #tpu.memory_space<vmem>>, vector<256x1xf32>,
    } else {
    }
    %c0 = arith.constant 0 : index
    %c0_1 = arith.constant 0 : index
    %3 = vector.load %arg8[%c0, %c0_1] : memref<256x128xf32, #tpu.memory_space<vmem>>, vector<256x128xf32>
    %c0_2 = arith.constant 0 : index
    %c0_3 = arith.constant 0 : index
    %4 = vector.load %arg5[%c0_2, %c0_3] : memref<128x128xf32, #tpu.memory_space<vmem>>, vector<128x128xf32>
    %cst = arith.constant dense<0.000000e+00> : vector<256x128xf32>
    %5 = tpu.matmul %3, %4, %cst {dimension_numbers = #tpu.dot_dimension_numbers<[1], [0], [0], [1], [0, 0, 1, 1], [], []>} : vector<256x128xf32>, vector<128x128xf32>, vector<256x128xf32> -> vector<256x128xf32>
    %c0_4 = arith.constant 0 : index
    %c0_5 = arith.constant 0 : index
    %6 = vector.load %arg6[%c0_4, %c0_5] : memref<1x128xf32, #tpu.memory_space<vmem>>, vector<1x128xf32>
    %7 = vector.broadcast %6 : vector<1x128xf32> to vector<256x128xf32>
    %8 = arith.addf %5, %7 : vector<256x128xf32>
    %c128_i32 = arith.constant 128 : i32
    %9 = arith.muli %arg1, %c128_i32 : i32
    %10 = tpu.assume_multiple %9, 128 : i32
    %c0_6 = arith.constant 0 : index
    %11 = arith.index_cast %10 : i32 to index
    %12 = vector.load %arg7[%c0_6, %11] : memref<256x128xf32, #tpu.memory_space<vmem>>, vector<256x128xf32>
    tpu.vector_store %arg7[%c0_6, %11], %8 {strides = array<i32>} : memref<256x128xf32, #tpu.memory_space<vmem>>, vector<256x128xf32>,
    %c0_7 = arith.constant 0 : index
    %c0_8 = arith.constant 0 : index
    %13 = vector.load %arg9[%c0_7, %c0_8] : memref<256x1xf32, #tpu.memory_space<vmem>>, vector<256x1xf32>
    %cst_9 = arith.constant dense<0xFF800000> : vector<256xf32>
    %14 = vector.multi_reduction <maximumf>, %8, %cst_9 [1] : vector<256x128xf32> to vector<256xf32>
    %15 = vector.shape_cast %14 : vector<256xf32> to vector<256x1xf32>
    %16 = arith.maximumf %13, %15 : vector<256x1xf32>
    %c0_10 = arith.constant 0 : index
    %c0_11 = arith.constant 0 : index
    %17 = vector.load %arg10[%c0_10, %c0_11] : memref<256x1xf32, #tpu.memory_space<vmem>>, vector<256x1xf32>
    %18 = arith.subf %13, %16 : vector<256x1xf32>
    %19 = math.exp %18 : vector<256x1xf32>
    %20 = arith.mulf %17, %19 : vector<256x1xf32>
    %21 = vector.broadcast %16 : vector<256x1xf32> to vector<256x128xf32>
    %22 = arith.subf %8, %21 : vector<256x128xf32>
    %23 = math.exp %22 : vector<256x128xf32>
    %cst_12 = arith.constant dense<0.000000e+00> : vector<256xf32>
    %24 = vector.multi_reduction <add>, %23, %cst_12 [1] : vector<256x128xf32> to vector<256xf32>
    %25 = vector.shape_cast %24 : vector<256xf32> to vector<256x1xf32>
    %26 = arith.addf %20, %25 : vector<256x1xf32>
    %c0_13 = arith.constant 0 : index
    %c0_14 = arith.constant 0 : index
    %27 = vector.load %arg10[%c0_13, %c0_14] : memref<256x1xf32, #tpu.memory_space<vmem>>, vector<256x1xf32>
    tpu.vector_store %arg10[%c0_13, %c0_14], %26 {strides = array<i32>} : memref<256x1xf32, #tpu.memory_space<vmem>>, vector<256x1xf32>,
    %c0_15 = arith.constant 0 : index
    %c0_16 = arith.constant 0 : index
    %28 = vector.load %arg9[%c0_15, %c0_16] : memref<256x1xf32, #tpu.memory_space<vmem>>, vector<256x1xf32>
    tpu.vector_store %arg9[%c0_15, %c0_16], %16 {strides = array<i32>} : memref<256x1xf32, #tpu.memory_space<vmem>>, vector<256x1xf32>,
    %c0_i32_17 = arith.constant 0 : i32
    %29 = arith.cmpi eq, %arg1, %c0_i32_17 : i32
    %30 = arith.extui %29 : i1 to i32
    %c0_i32_18 = arith.constant 0 : i32
    %31 = arith.cmpi ne, %30, %c0_i32_18 : i32
    scf.if %31 {
      %c0_19 = arith.constant 0 : index
      %c0_20 = arith.constant 0 : index
      %32 = vector.load %arg9[%c0_19, %c0_20] : memref<256x1xf32, #tpu.memory_space<vmem>>, vector<256x1xf32>
      %c0_21 = arith.constant 0 : index
      %c0_22 = arith.constant 0 : index
      %33 = vector.load %arg10[%c0_21, %c0_22] : memref<256x1xf32, #tpu.memory_space<vmem>>, vector<256x1xf32>
      %34 = math.log %33 : vector<256x1xf32>
      %35 = arith.addf %32, %34 : vector<256x1xf32>
      %c0_23 = arith.constant 0 : index
      %c0_24 = arith.constant 0 : index
      %36 = vector.load %arg7[%c0_23, %c0_24] : memref<256x128xf32, #tpu.memory_space<vmem>>, vector<256x128xf32>
      %37 = vector.broadcast %35 : vector<256x1xf32> to vector<256x128xf32>
      %38 = arith.subf %36, %37 : vector<256x128xf32>
      %c0_25 = arith.constant 0 : index
      %c0_26 = arith.constant 0 : index
      %39 = vector.load %arg7[%c0_25, %c0_26] : memref<256x128xf32, #tpu.memory_space<vmem>>, vector<256x128xf32>
      tpu.vector_store %arg7[%c0_25, %c0_26], %38 {strides = array<i32>} : memref<256x128xf32, #tpu.memory_space<vmem>>, vector<256x128xf32>,
    } else {
    }
    return
  }
  func.func @transform_0(%arg0: i32, %arg1: i32) -> (i32, i32) {
    %c0_i32 = arith.constant 0 : i32
    %c0_i32_0 = arith.constant 0 : i32
    return %arg0, %c0_i32 : i32, i32
  }
  func.func @transform_1(%arg0: i32, %arg1: i32) -> (i32, i32) {
    %c0_i32 = arith.constant 0 : i32
    %c0_i32_0 = arith.constant 0 : i32
    %c0_i32_1 = arith.constant 0 : i32
    return %c0_i32, %c0_i32_0 : i32, i32
  }
  func.func @transform_2(%arg0: i32, %arg1: i32) -> (i32, i32) {
    %c0_i32 = arith.constant 0 : i32
    %c0_i32_0 = arith.constant 0 : i32
    %c0_i32_1 = arith.constant 0 : i32
    return %c0_i32, %c0_i32_0 : i32, i32
  }
  func.func @transform_3(%arg0: i32, %arg1: i32) -> (i32, i32) {
    %c0_i32 = arith.constant 0 : i32
    %c0_i32_0 = arith.constant 0 : i32
    return %c0_i32, %arg1 : i32, i32
  }
  func.func @transform_4(%arg0: i32, %arg1: i32) -> (i32, i32) {
    %c0_i32 = arith.constant 0 : i32
    %c0_i32_0 = arith.constant 0 : i32
    return %c0_i32, %arg1 : i32, i32
  }
  func.func @transform_5(%arg0: i32, %arg1: i32) -> (i32, i32) {
    %c0_i32 = arith.constant 0 : i32
    %c0_i32_0 = arith.constant 0 : i32
    return %arg0, %c0_i32 : i32, i32
  }
}

</mosaic_0001>

<bundles_post_ra>
// kernel: _generator_forward_impl.1
= control target key start
LH: loop header
LB: loop body
LE: loop exit
PB: predicated region body
PF: predicated region fallthrough
CT: control target
= control target key end

     0   :  { %vm67_vm0 = vcmask 261120   ;;  %vm453_vm1 = vcmask 7168   ;;  %s3704_s1 = inlined_call_operand.vmem [shape: f32[32,128], index: 1, kind: input, shape index: {}]   ;;  %s3705_s0 = inlined_call_operand.vmem [shape: f32[256,32], index: 0, kind: input, shape index: {}]   ;;  %s3706_s3 = inlined_call_operand.vmem [shape: f32[128,128], index: 3, kind: input, shape index: {}]   ;;  %s3707_s2 = inlined_call_operand.vmem [shape: f32[1,128], index: 2, kind: input, shape index: {}]   ;;  %s3708_s4 = inlined_call_operand.vmem [shape: f32[1,128], index: 4, kind: input, shape index: {}]   ;;  %s3709_s5 = inlined_call_operand.vmem [shape: f32[256,128], index: 5, kind: output, shape index: {}]  }
   0x1   :  { %v59_v0 = vld [vmem:[%s3704_s1 + $0x18] sm:$0xff]  ;;  %v58_v1 = vld [vmem:[%s3704_s1 + $0x10] sm:$0xff]  ;;  %v24_v2 = vld [vmem:[%s3705_s0] sm:$0xff] }
   0x2   :  { %2081 = vmatprep.subr.mxu0 %v59_v0  ;;  %v57_v3 = vld [vmem:[%s3704_s1 + $0x8] sm:$0xff]  ;;  %2089 = vmatprep.mubr.msk.f32.mxu0 %vm67_vm0, %v24_v2  ;;  %v56_v4 = vld [vmem:[%s3704_s1] sm:$0xff]  ;;  %v26_v6 = vld [vmem:[%s3705_s0 + $0x10] sm:$0xff] }
   0x3   :  { %2082 = vmatpush3.msra.mxu0 %v59_v0  ;;  %v25_v5 = vld [vmem:[%s3705_s0 + $0x8] sm:$0xff]  ;;  %v27_v7 = vld [vmem:[%s3705_s0 + $0x18] sm:$0xff]  ;;  %v28_v8 = vld [vmem:[%s3705_s0 + $0x20] sm:$0xff] }
   0x4   :  { %2083 = vmatprep.subr.mxu0 %v58_v1  ;;  %v565_v9 = vld [vmem:[%s3706_s3 + $0x78] sm:$0xff]  ;;  %v564_v10 = vld [vmem:[%s3706_s3 + $0x70] sm:$0xff]  ;;  %v29_v11 = vld [vmem:[%s3705_s0 + $0x28] sm:$0xff] }
   0x5   :  { %2084 = vmatpush3.msra.mxu0 %v58_v1  ;;  %v563_v12 = vld [vmem:[%s3706_s3 + $0x68] sm:$0xff]  ;;  %v30_v13 = vld [vmem:[%s3705_s0 + $0x30] sm:$0xff]  ;;  %2217 = vmatprep.subr.mxu1 %v565_v9  ;;  %v562_v14 = vld [vmem:[%s3706_s3 + $0x60] sm:$0xff] }
   0x6   :  { %2085 = vmatprep.subr.mxu0 %v57_v3  ;;  %2233 = vmatpush3.msra.mxu1 %v565_v9  ;;  %v31_v15 = vld [vmem:[%s3705_s0 + $0x38] sm:$0xff]  ;;  %v32_v17 = vld [vmem:[%s3705_s0 + $0x40] sm:$0xff]  ;;  %v560_v18 = vld [vmem:[%s3706_s3 + $0x50] sm:$0xff] }
   0x7   :  { %2086 = vmatpush3.msra.mxu0 %v57_v3  ;;  %v561_v16 = vld [vmem:[%s3706_s3 + $0x58] sm:$0xff]  ;;  %2218 = vmatprep.subr.mxu1 %v564_v10  ;;  %v33_v19 = vld [vmem:[%s3705_s0 + $0x48] sm:$0xff]  ;;  %v34_v21 = vld [vmem:[%s3705_s0 + $0x50] sm:$0xff] }
   0x8   :  { %2087 = vmatprep.subr.mxu0 %v56_v4  ;;  %2234 = vmatpush3.msra.mxu1 %v564_v10  ;;  %v559_v20 = vld [vmem:[%s3706_s3 + $0x48] sm:$0xff]  ;;  %v558_v22 = vld [vmem:[%s3706_s3 + $0x40] sm:$0xff]  ;;  %v35_v23 = vld [vmem:[%s3705_s0 + $0x58] sm:$0xff] }
   0x9   :  { %2088 = vmatpush3.msra.mxu0 %v56_v4  ;;  %2219 = vmatprep.subr.mxu1 %v563_v12  ;;  %v557_v24 = vld [vmem:[%s3706_s3 + $0x38] sm:$0xff]  ;;  %v36_v25 = vld [vmem:[%s3705_s0 + $0x60] sm:$0xff]  ;;  %v556_v26 = vld [vmem:[%s3706_s3 + $0x30] sm:$0xff] }
   0xa   :  { %2090 = vmatmul.mubr.msk.f32.vlgmr.msra.gmra.mxu0 %vm67_vm0, %v25_v5  ;;  %2137 = vmatprep.subr.mxu0 %v565_v9  ;;  %v37_v27 = vld [vmem:[%s3705_s0 + $0x68] sm:$0xff]  ;;  %v38_v29 = vld [vmem:[%s3705_s0 + $0x70] sm:$0xff]  ;;  %v554_v30 = vld [vmem:[%s3706_s3 + $0x20] sm:$0xff] }
   0xb   :  { %2092 = vmatprep.mubr.msk.f32.mxu0 %vm67_vm0, %v26_v6  ;;  %2138 = vmatpush3.msra.mxu0 %v565_v9  ;;  %v555_v28 = vld [vmem:[%s3706_s3 + $0x28] sm:$0xff]  ;;  %v39_v31 = vld [vmem:[%s3705_s0 + $0x78] sm:$0xff]  ;;  %v40_v33 = vld [vmem:[%s3705_s0 + $0x80] sm:$0xff] }
   0xc   :  { %2139 = vmatprep.subr.mxu0 %v564_v10  ;;  %2235 = vmatpush3.msra.mxu1 %v563_v12  ;;  %v553_v32 = vld [vmem:[%s3706_s3 + $0x18] sm:$0xff]  ;;  %v552_v34 = vld [vmem:[%s3706_s3 + $0x10] sm:$0xff]  ;;  %v41_v35 = vld [vmem:[%s3705_s0 + $0x88] sm:$0xff] }
   0xd   :  { %2140 = vmatpush3.msra.mxu0 %v564_v10  ;;  %2220 = vmatprep.subr.mxu1 %v562_v14  ;;  %v551_v36 = vld [vmem:[%s3706_s3 + $0x8] sm:$0xff]  ;;  %v42_v37 = vld [vmem:[%s3705_s0 + $0x90] sm:$0xff]  ;;  %v43_v38 = vld [vmem:[%s3705_s0 + $0x98] sm:$0xff] }
   0xe   :  { %2093 = vmatmul.mubr.msk.f32.gmra.mxu0 %vm67_vm0, %v27_v7  ;;  %2141 = vmatprep.subr.mxu0 %v563_v12  ;;  %v44_v39 = vld [vmem:[%s3705_s0 + $0xa0] sm:$0xff]  ;;  %v45_v40 = vld [vmem:[%s3705_s0 + $0xa8] sm:$0xff]  ;;  %v46_v41 = vld [vmem:[%s3705_s0 + $0xb0] sm:$0xff] }
   0xf   :  { %2095 = vmatprep.mubr.msk.f32.mxu0 %vm67_vm0, %v28_v8  ;;  %2142 = vmatpush3.msra.mxu0 %v563_v12  ;;  %v47_v42 = vld [vmem:[%s3705_s0 + $0xb8] sm:$0xff]  ;;  %v48_v43 = vld [vmem:[%s3705_s0 + $0xc0] sm:$0xff]  ;;  %v49_v44 = vld [vmem:[%s3705_s0 + $0xc8] sm:$0xff] }
  0x10   :  { %2143 = vmatprep.subr.mxu0 %v562_v14  ;;  %2236 = vmatpush3.msra.mxu1 %v562_v14  ;;  %v50_v45 = vld [vmem:[%s3705_s0 + $0xd0] sm:$0xff]  ;;  %v51_v46 = vld [vmem:[%s3705_s0 + $0xd8] sm:$0xff]  ;;  %v52_v47 = vld [vmem:[%s3705_s0 + $0xe0] sm:$0xff] }
  0x11   :  { %2144 = vmatpush3.msra.mxu0 %v562_v14  ;;  %2221 = vmatprep.subr.mxu1 %v561_v16  ;;  %v53_v48 = vld [vmem:[%s3705_s0 + $0xe8] sm:$0xff]  ;;  %v54_v49 = vld [vmem:[%s3705_s0 + $0xf0] sm:$0xff]  ;;  %v55_v50 = vld [vmem:[%s3705_s0 + $0xf8] sm:$0xff] }
  0x12   :  { %2096 = vmatmul.mubr.msk.f32.gmra.mxu0 %vm67_vm0, %v29_v11  ;;  %2145 = vmatprep.subr.mxu0 %v561_v16  ;;  %v550_v51 = vld [vmem:[%s3706_s3] sm:$0xff] }
  0x13   :  { %2098 = vmatprep.mubr.msk.f32.mxu0 %vm67_vm0, %v30_v13  ;;  %2146 = vmatpush3.msra.mxu0 %v561_v16  ;;  %v2670_v52 = vld [vmem:[%s3707_s2] ss:$0 sm:$0xff] }
  0x14   :  { %2147 = vmatprep.subr.mxu0 %v560_v18  ;;  %2237 = vmatpush3.msra.mxu1 %v561_v16 }
  0x15   :  { %2148 = vmatpush3.msra.mxu0 %v560_v18  ;;  %2222 = vmatprep.subr.mxu1 %v560_v18 }
  0x16   :  { %2099 = vmatmul.mubr.msk.f32.gmra.mxu0 %vm67_vm0, %v31_v15  ;;  %2149 = vmatprep.subr.mxu0 %v559_v20 }
  0x17   :  { %2101 = vmatprep.mubr.msk.f32.mxu0 %vm67_vm0, %v32_v17  ;;  %2150 = vmatpush3.msra.mxu0 %v559_v20 }
  0x18   :  { %2151 = vmatprep.subr.mxu0 %v558_v22  ;;  %2238 = vmatpush3.msra.mxu1 %v560_v18 }
  0x19   :  { %2152 = vmatpush3.msra.mxu0 %v558_v22  ;;  %2223 = vmatprep.subr.mxu1 %v559_v20 }
  0x1a   :  { %2102 = vmatmul.mubr.msk.f32.gmra.mxu0 %vm67_vm0, %v33_v19  ;;  %2153 = vmatprep.subr.mxu0 %v557_v24 }
  0x1b   :  { %2104 = vmatprep.mubr.msk.f32.mxu0 %vm67_vm0, %v34_v21  ;;  %2154 = vmatpush3.msra.mxu0 %v557_v24 }
  0x1c   :  { %2155 = vmatprep.subr.mxu0 %v556_v26  ;;  %2239 = vmatpush3.msra.mxu1 %v559_v20 }
  0x1d   :  { %2156 = vmatpush3.msra.mxu0 %v556_v26  ;;  %2224 = vmatprep.subr.mxu1 %v558_v22 }
  0x1e   :  { %2105 = vmatmul.mubr.msk.f32.gmra.mxu0 %vm67_vm0, %v35_v23  ;;  %2157 = vmatprep.subr.mxu0 %v555_v28 }
  0x1f   :  { %2107 = vmatprep.mubr.msk.f32.mxu0 %vm67_vm0, %v36_v25  ;;  %2158 = vmatpush3.msra.mxu0 %v555_v28 }
  0x20   :  { %2159 = vmatprep.subr.mxu0 %v554_v30  ;;  %2240 = vmatpush3.msra.mxu1 %v558_v22 }
  0x21   :  { %2160 = vmatpush3.msra.mxu0 %v554_v30  ;;  %2225 = vmatprep.subr.mxu1 %v557_v24 }
  0x22   :  { %2108 = vmatmul.mubr.msk.f32.gmra.mxu0 %vm67_vm0, %v37_v27  ;;  %2161 = vmatprep.subr.mxu0 %v553_v32 }
  0x23   :  { %2110 = vmatprep.mubr.msk.f32.mxu0 %vm67_vm0, %v38_v29  ;;  %2162 = vmatpush3.msra.mxu0 %v553_v32 }
  0x24   :  { %2163 = vmatprep.subr.mxu0 %v552_v34  ;;  %2241 = vmatpush3.msra.mxu1 %v557_v24 }
  0x25   :  { %2164 = vmatpush3.msra.mxu0 %v552_v34  ;;  %2226 = vmatprep.subr.mxu1 %v556_v26 }
  0x26   :  { %2111 = vmatmul.mubr.msk.f32.gmra.mxu0 %vm67_vm0, %v39_v31  ;;  %2165 = vmatprep.subr.mxu0 %v551_v36 }
  0x27   :  { %2113 = vmatprep.mubr.msk.f32.mxu0 %vm67_vm0, %v40_v33  ;;  %2166 = vmatpush3.msra.mxu0 %v551_v36 }
  0x28   :  { %2242 = vmatpush3.msra.mxu1 %v556_v26  ;;  %2167 = vmatprep.subr.mxu0 %v550_v51 }
  0x29   :  { %2227 = vmatprep.subr.mxu1 %v555_v28  ;;  %2168 = vmatpush3.msra.mxu0 %v550_v51 }
  0x2a   :  { %2114 = vmatmul.mubr.msk.f32.gmra.mxu0 %vm67_vm0, %v41_v35  ;;  %2243 = vmatpush3.msra.mxu1 %v555_v28 }
  0x2b   :  { %2116 = vmatprep.mubr.msk.f32.mxu0 %vm67_vm0, %v42_v37  ;;  %2228 = vmatprep.subr.mxu1 %v554_v30 }
  0x2c   :  { %2244 = vmatpush3.msra.mxu1 %v554_v30 }
  0x2d   :  { %2229 = vmatprep.subr.mxu1 %v553_v32 }
  0x2e   :  { %2117 = vmatmul.mubr.msk.f32.gmra.mxu0 %vm67_vm0, %v43_v38  ;;  %2245 = vmatpush3.msra.mxu1 %v553_v32 }
  0x2f   :  { %2119 = vmatprep.mubr.msk.f32.mxu0 %vm67_vm0, %v44_v39  ;;  %2230 = vmatprep.subr.mxu1 %v552_v34 }
  0x30   :  { %2246 = vmatpush3.msra.mxu1 %v552_v34 }
  0x31   :  { %2231 = vmatprep.subr.mxu1 %v551_v36 }
  0x32   :  { %2120 = vmatmul.mubr.msk.f32.gmra.mxu0 %vm67_vm0, %v45_v40  ;;  %2247 = vmatpush3.msra.mxu1 %v551_v36 }
  0x33   :  { %2122 = vmatprep.mubr.msk.f32.mxu0 %vm67_vm0, %v46_v41  ;;  %2232 = vmatprep.subr.mxu1 %v550_v51 }
  0x34   :  { %2248 = vmatpush3.msra.mxu1 %v550_v51 }
  0x36   :  { %2123 = vmatmul.mubr.msk.f32.gmra.mxu0 %vm67_vm0, %v47_v42 }
  0x37   :  { %2125 = vmatprep.mubr.msk.f32.mxu0 %vm67_vm0, %v48_v43 }
  0x3a   :  { %2126 = vmatmul.mubr.msk.f32.gmra.mxu0 %vm67_vm0, %v49_v44 }
  0x3b   :  { %2128 = vmatprep.mubr.msk.f32.mxu0 %vm67_vm0, %v50_v45 }
  0x3e   :  { %2129 = vmatmul.mubr.msk.f32.gmra.mxu0 %vm67_vm0, %v51_v46 }
  0x3f   :  { %2131 = vmatprep.mubr.msk.f32.mxu0 %vm67_vm0, %v52_v47 }
  0x42   :  { %2132 = vmatmul.mubr.msk.f32.gmra.mxu0 %vm67_vm0, %v53_v48 }
  0x43   :  { %2134 = vmatprep.mubr.msk.f32.mxu0 %vm67_vm0, %v54_v49 }
  0x46   :  { %2135 = vmatmul.mubr.msk.f32.gmra.mxu0 %vm67_vm0, %v55_v50 }
  0xca   :  { %v2091_v53 = vpop.f32.mrf.mxu0 }
  0xcb   :  { %v236_v54 = vadd.f32 %v2091_v53, %v2670_v52 }
  0xcc   :  { %v230_v55 = vpop.f32.mrf.mxu0 }
  0xcd   :  { %v231_v56 = vadd.f32 %v2670_v52, %v230_v55  ;;  %v390_v59 = vmax.f32 %v236_v54, 0.0 }
  0xce   :  { %v2094_v57 = vpop.f32.mrf.mxu0 }
  0xcf   :  { %v389_v58 = vmax.f32 %v231_v56, 0.0  ;;  %v246_v60 = vadd.f32 %v2094_v57, %v2670_v52 }
  0xd0   :  { %v240_v61 = vpop.f32.mrf.mxu0 }
  0xd1   :  { %v241_v62 = vadd.f32 %v2670_v52, %v240_v61  ;;  %2169 = vmatprep.mubr.f32.mxu0 %v389_v58  ;;  %v392_v2 = vmax.f32 %v246_v60, 0.0 }
  0xd2   :  { %v2097_v63 = vpop.f32.mrf.mxu0  ;;  %2170 = vmatmul.mubr.f32.vlgmr.msra.gmra.mxu0 %v390_v59 }
  0xd3   :  { %v391_v0 = vmax.f32 %v241_v62, 0.0  ;;  %v256_v1 = vadd.f32 %v2097_v63, %v2670_v52 }
  0xd4   :  { %v250_v3 = vpop.f32.mrf.mxu0 }
  0xd5   :  { %v251_v4 = vadd.f32 %v2670_v52, %v250_v3  ;;  %2172 = vmatprep.mubr.f32.mxu0 %v391_v0  ;;  %v394_v5 = vmax.f32 %v256_v1, 0.0 }
  0xd6   :  { %2173 = vmatmul.mubr.f32.gmra.mxu0 %v392_v2  ;;  %v2100_v6 = vpop.f32.mrf.mxu0 }
  0xd7   :  { %v393_v7 = vmax.f32 %v251_v4, 0.0  ;;  %v266_v8 = vadd.f32 %v2100_v6, %v2670_v52 }
  0xd8   :  { %v260_v9 = vpop.f32.mrf.mxu0 }
  0xd9   :  { %2175 = vmatprep.mubr.f32.mxu0 %v393_v7  ;;  %v261_v10 = vadd.f32 %v2670_v52, %v260_v9  ;;  %v396_v11 = vmax.f32 %v266_v8, 0.0 }
  0xda   :  { %2176 = vmatmul.mubr.f32.gmra.mxu0 %v394_v5  ;;  %v2103_v12 = vpop.f32.mrf.mxu0 }
  0xdb   :  { %v276_v13 = vadd.f32 %v2103_v12, %v2670_v52  ;;  %v395_v14 = vmax.f32 %v261_v10, 0.0 }
  0xdc   :  { %v270_v15 = vpop.f32.mrf.mxu0 }
  0xdd   :  { %v271_v16 = vadd.f32 %v2670_v52, %v270_v15  ;;  %2178 = vmatprep.mubr.f32.mxu1 %v395_v14  ;;  %v398_v17 = vmax.f32 %v276_v13, 0.0 }
  0xde   :  { %2179 = vmatmul.mubr.f32.vlgmr.msra.gmra.mxu1 %v396_v11  ;;  %v2106_v18 = vpop.f32.mrf.mxu0 }
  0xdf   :  { %v397_v19 = vmax.f32 %v271_v16, 0.0  ;;  %v286_v20 = vadd.f32 %v2106_v18, %v2670_v52 }
  0xe0   :  { %v280_v21 = vpop.f32.mrf.mxu0 }
  0xe1   :  { %v281_v22 = vadd.f32 %v2670_v52, %v280_v21  ;;  %2181 = vmatprep.mubr.f32.mxu1 %v397_v19  ;;  %v400_v23 = vmax.f32 %v286_v20, 0.0 }
  0xe2   :  { %v2109_v24 = vpop.f32.mrf.mxu0  ;;  %2182 = vmatmul.mubr.f32.gmra.mxu1 %v398_v17 }
  0xe3   :  { %v399_v25 = vmax.f32 %v281_v22, 0.0  ;;  %v296_v26 = vadd.f32 %v2109_v24, %v2670_v52  ;;  %v2446_v22 = vmov -inf  }
  0xe4   :  { %v290_v27 = vpop.f32.mrf.mxu0  ;;  %455 = vst.msk [vmem:[#allocation3 + $0x8] sm:$0xff] %vm453_vm1, %v2446_v22  ;;  %454 = vst.msk [vmem:[#allocation3] sm:$0xff] %vm453_vm1, %v2446_v22 }
  0xe5   :  { %v291_v28 = vadd.f32 %v2670_v52, %v290_v27  ;;  %2184 = vmatprep.mubr.f32.mxu1 %v399_v25  ;;  %v402_v29 = vmax.f32 %v296_v26, 0.0  ;;  %456 = vst.msk [vmem:[#allocation3 + $0x10] sm:$0xff] %vm453_vm1, %v2446_v22  ;;  %457 = vst.msk [vmem:[#allocation3 + $0x18] sm:$0xff] %vm453_vm1, %v2446_v22 }
  0xe6   :  { %v2112_v30 = vpop.f32.mrf.mxu0  ;;  %2185 = vmatmul.mubr.f32.gmra.mxu1 %v400_v23  ;;  %458 = vst.msk [vmem:[#allocation3 + $0x20] sm:$0xff] %vm453_vm1, %v2446_v22  ;;  %459 = vst.msk [vmem:[#allocation3 + $0x28] sm:$0xff] %vm453_vm1, %v2446_v22 }
  0xe7   :  { %v401_v31 = vmax.f32 %v291_v28, 0.0  ;;  %v306_v32 = vadd.f32 %v2112_v30, %v2670_v52  ;;  %460 = vst.msk [vmem:[#allocation3 + $0x30] sm:$0xff] %vm453_vm1, %v2446_v22  ;;  %461 = vst.msk [vmem:[#allocation3 + $0x38] sm:$0xff] %vm453_vm1, %v2446_v22 }
  0xe8   :  { %v300_v33 = vpop.f32.mrf.mxu0  ;;  %462 = vst.msk [vmem:[#allocation3 + $0x40] sm:$0xff] %vm453_vm1, %v2446_v22  ;;  %463 = vst.msk [vmem:[#allocation3 + $0x48] sm:$0xff] %vm453_vm1, %v2446_v22 }
  0xe9   :  { %v301_v34 = vadd.f32 %v2670_v52, %v300_v33  ;;  %2187 = vmatprep.mubr.f32.mxu1 %v401_v31  ;;  %v404_v35 = vmax.f32 %v306_v32, 0.0  ;;  %464 = vst.msk [vmem:[#allocation3 + $0x50] sm:$0xff] %vm453_vm1, %v2446_v22  ;;  %465 = vst.msk [vmem:[#allocation3 + $0x58] sm:$0xff] %vm453_vm1, %v2446_v22 }
  0xea   :  { %v2115_v36 = vpop.f32.mrf.mxu0  ;;  %2188 = vmatmul.mubr.f32.gmra.mxu1 %v402_v29  ;;  %466 = vst.msk [vmem:[#allocation3 + $0x60] sm:$0xff] %vm453_vm1, %v2446_v22  ;;  %467 = vst.msk [vmem:[#allocation3 + $0x68] sm:$0xff] %vm453_vm1, %v2446_v22 }
  0xeb   :  { %v403_v37 = vmax.f32 %v301_v34, 0.0  ;;  %v316_v38 = vadd.f32 %v2115_v36, %v2670_v52  ;;  %468 = vst.msk [vmem:[#allocation3 + $0x70] sm:$0xff] %vm453_vm1, %v2446_v22  ;;  %469 = vst.msk [vmem:[#allocation3 + $0x78] sm:$0xff] %vm453_vm1, %v2446_v22 }
  0xec   :  { %v310_v39 = vpop.f32.mrf.mxu0  ;;  %470 = vst.msk [vmem:[#allocation3 + $0x80] sm:$0xff] %vm453_vm1, %v2446_v22  ;;  %471 = vst.msk [vmem:[#allocation3 + $0x88] sm:$0xff] %vm453_vm1, %v2446_v22 }
  0xed   :  { %v311_v40 = vadd.f32 %v2670_v52, %v310_v39  ;;  %2190 = vmatprep.mubr.f32.mxu1 %v403_v37  ;;  %v406_v41 = vmax.f32 %v316_v38, 0.0  ;;  %472 = vst.msk [vmem:[#allocation3 + $0x90] sm:$0xff] %vm453_vm1, %v2446_v22  ;;  %473 = vst.msk [vmem:[#allocation3 + $0x98] sm:$0xff] %vm453_vm1, %v2446_v22  ;;  %v2447_v38 = vmov 0  }
  0xee   :  { %v2118_v42 = vpop.f32.mrf.mxu0  ;;  %2191 = vmatmul.mubr.f32.gmra.mxu1 %v404_v35  ;;  %474 = vst.msk [vmem:[#allocation3 + $0xa0] sm:$0xff] %vm453_vm1, %v2446_v22  ;;  %475 = vst.msk [vmem:[#allocation3 + $0xa8] sm:$0xff] %vm453_vm1, %v2446_v22  ;;  %2252 = vset.pattern.permute.xlu1 %v2447_v38 }
  0xef   :  { %v405_v43 = vmax.f32 %v311_v40, 0.0  ;;  %v326_v44 = vadd.f32 %v2118_v42, %v2670_v52  ;;  %476 = vst.msk [vmem:[#allocation3 + $0xb0] sm:$0xff] %vm453_vm1, %v2446_v22  ;;  %477 = vst.msk [vmem:[#allocation3 + $0xb8] sm:$0xff] %vm453_vm1, %v2446_v22  ;;  %2253 = vset.pattern.permute.xlu0 %v2447_v38 }
  0xf0   :  { %v320_v45 = vpop.f32.mrf.mxu0  ;;  %478 = vst.msk [vmem:[#allocation3 + $0xc0] sm:$0xff] %vm453_vm1, %v2446_v22  ;;  %479 = vst.msk [vmem:[#allocation3 + $0xc8] sm:$0xff] %vm453_vm1, %v2446_v22 }
  0xf1   :  { %v321_v46 = vadd.f32 %v2670_v52, %v320_v45  ;;  %2193 = vmatprep.mubr.f32.mxu1 %v405_v43  ;;  %v408_v47 = vmax.f32 %v326_v44, 0.0  ;;  %480 = vst.msk [vmem:[#allocation3 + $0xd0] sm:$0xff] %vm453_vm1, %v2446_v22  ;;  %481 = vst.msk [vmem:[#allocation3 + $0xd8] sm:$0xff] %vm453_vm1, %v2446_v22 }
  0xf2   :  { %v2121_v48 = vpop.f32.mrf.mxu0  ;;  %2194 = vmatmul.mubr.f32.gmra.mxu1 %v406_v41  ;;  %482 = vst.msk [vmem:[#allocation3 + $0xe0] sm:$0xff] %vm453_vm1, %v2446_v22  ;;  %483 = vst.msk [vmem:[#allocation3 + $0xe8] sm:$0xff] %vm453_vm1, %v2446_v22 }
  0xf3   :  { %v407_v49 = vmax.f32 %v321_v46, 0.0  ;;  %v336_v50 = vadd.f32 %v2121_v48, %v2670_v52  ;;  %484 = vst.msk [vmem:[#allocation3 + $0xf0] sm:$0xff] %vm453_vm1, %v2446_v22  ;;  %485 = vst.msk [vmem:[#allocation3 + $0xf8] sm:$0xff] %vm453_vm1, %v2446_v22 }
  0xf4   :  { %v330_v51 = vpop.f32.mrf.mxu0 }
  0xf5   :  { %v331_v53 = vadd.f32 %v2670_v52, %v330_v51  ;;  %2196 = vmatprep.mubr.f32.mxu1 %v407_v49  ;;  %v410_v54 = vmax.f32 %v336_v50, 0.0  ;;  %v2448_v51 = vmov 0.0  }
  0xf6   :  { %v2124_v55 = vpop.f32.mrf.mxu0  ;;  %2197 = vmatmul.mubr.f32.gmra.mxu1 %v408_v47  ;;  %487 = vst.msk [vmem:[#allocation4 + $0x8] sm:$0xff] %vm453_vm1, %v2448_v51  ;;  %486 = vst.msk [vmem:[#allocation4] sm:$0xff] %vm453_vm1, %v2448_v51 }
  0xf7   :  { %v409_v56 = vmax.f32 %v331_v53, 0.0  ;;  %v346_v57 = vadd.f32 %v2124_v55, %v2670_v52  ;;  %488 = vst.msk [vmem:[#allocation4 + $0x10] sm:$0xff] %vm453_vm1, %v2448_v51  ;;  %489 = vst.msk [vmem:[#allocation4 + $0x18] sm:$0xff] %vm453_vm1, %v2448_v51 }
  0xf8   :  { %v340_v58 = vpop.f32.mrf.mxu0  ;;  %490 = vst.msk [vmem:[#allocation4 + $0x20] sm:$0xff] %vm453_vm1, %v2448_v51  ;;  %491 = vst.msk [vmem:[#allocation4 + $0x28] sm:$0xff] %vm453_vm1, %v2448_v51 }
  0xf9   :  { %v341_v59 = vadd.f32 %v2670_v52, %v340_v58  ;;  %2199 = vmatprep.mubr.f32.mxu1 %v409_v56  ;;  %v412_v60 = vmax.f32 %v346_v57, 0.0  ;;  %492 = vst.msk [vmem:[#allocation4 + $0x30] sm:$0xff] %vm453_vm1, %v2448_v51  ;;  %493 = vst.msk [vmem:[#allocation4 + $0x38] sm:$0xff] %vm453_vm1, %v2448_v51 }
  0xfa   :  { %v2127_v61 = vpop.f32.mrf.mxu0  ;;  %2200 = vmatmul.mubr.f32.gmra.mxu1 %v410_v54  ;;  %494 = vst.msk [vmem:[#allocation4 + $0x40] sm:$0xff] %vm453_vm1, %v2448_v51  ;;  %495 = vst.msk [vmem:[#allocation4 + $0x48] sm:$0xff] %vm453_vm1, %v2448_v51 }
  0xfb   :  { %v411_v62 = vmax.f32 %v341_v59, 0.0  ;;  %v356_v63 = vadd.f32 %v2127_v61, %v2670_v52  ;;  %496 = vst.msk [vmem:[#allocation4 + $0x50] sm:$0xff] %vm453_vm1, %v2448_v51  ;;  %497 = vst.msk [vmem:[#allocation4 + $0x58] sm:$0xff] %vm453_vm1, %v2448_v51 }
  0xfc   :  { %v350_v0 = vpop.f32.mrf.mxu0  ;;  %498 = vst.msk [vmem:[#allocation4 + $0x60] sm:$0xff] %vm453_vm1, %v2448_v51  ;;  %499 = vst.msk [vmem:[#allocation4 + $0x68] sm:$0xff] %vm453_vm1, %v2448_v51 }
  0xfd   :  { %v351_v1 = vadd.f32 %v2670_v52, %v350_v0  ;;  %2202 = vmatprep.mubr.f32.mxu1 %v411_v62  ;;  %v414_v2 = vmax.f32 %v356_v63, 0.0  ;;  %500 = vst.msk [vmem:[#allocation4 + $0x70] sm:$0xff] %vm453_vm1, %v2448_v51  ;;  %501 = vst.msk [vmem:[#allocation4 + $0x78] sm:$0xff] %vm453_vm1, %v2448_v51 }
  0xfe   :  { %v2130_v3 = vpop.f32.mrf.mxu0  ;;  %2203 = vmatmul.mubr.f32.gmra.mxu1 %v412_v60  ;;  %502 = vst.msk [vmem:[#allocation4 + $0x80] sm:$0xff] %vm453_vm1, %v2448_v51  ;;  %503 = vst.msk [vmem:[#allocation4 + $0x88] sm:$0xff] %vm453_vm1, %v2448_v51 }
  0xff   :  { %v413_v4 = vmax.f32 %v351_v1, 0.0  ;;  %v366_v5 = vadd.f32 %v2130_v3, %v2670_v52  ;;  %504 = vst.msk [vmem:[#allocation4 + $0x90] sm:$0xff] %vm453_vm1, %v2448_v51  ;;  %505 = vst.msk [vmem:[#allocation4 + $0x98] sm:$0xff] %vm453_vm1, %v2448_v51 }
 0x100   :  { %v360_v6 = vpop.f32.mrf.mxu0  ;;  %506 = vst.msk [vmem:[#allocation4 + $0xa0] sm:$0xff] %vm453_vm1, %v2448_v51  ;;  %507 = vst.msk [vmem:[#allocation4 + $0xa8] sm:$0xff] %vm453_vm1, %v2448_v51 }
 0x101   :  { %v361_v7 = vadd.f32 %v2670_v52, %v360_v6  ;;  %2205 = vmatprep.mubr.f32.mxu1 %v413_v4  ;;  %v416_v8 = vmax.f32 %v366_v5, 0.0  ;;  %508 = vst.msk [vmem:[#allocation4 + $0xb0] sm:$0xff] %vm453_vm1, %v2448_v51  ;;  %509 = vst.msk [vmem:[#allocation4 + $0xb8] sm:$0xff] %vm453_vm1, %v2448_v51 }
 0x102   :  { %v2133_v9 = vpop.f32.mrf.mxu0  ;;  %2206 = vmatmul.mubr.f32.gmra.mxu1 %v414_v2  ;;  %510 = vst.msk [vmem:[#allocation4 + $0xc0] sm:$0xff] %vm453_vm1, %v2448_v51  ;;  %511 = vst.msk [vmem:[#allocation4 + $0xc8] sm:$0xff] %vm453_vm1, %v2448_v51 }
 0x103   :  { %v415_v10 = vmax.f32 %v361_v7, 0.0  ;;  %v376_v11 = vadd.f32 %v2133_v9, %v2670_v52  ;;  %512 = vst.msk [vmem:[#allocation4 + $0xd0] sm:$0xff] %vm453_vm1, %v2448_v51  ;;  %513 = vst.msk [vmem:[#allocation4 + $0xd8] sm:$0xff] %vm453_vm1, %v2448_v51 }
 0x104   :  { %v370_v12 = vpop.f32.mrf.mxu0  ;;  %514 = vst.msk [vmem:[#allocation4 + $0xe0] sm:$0xff] %vm453_vm1, %v2448_v51  ;;  %515 = vst.msk [vmem:[#allocation4 + $0xe8] sm:$0xff] %vm453_vm1, %v2448_v51 }
 0x105   :  { %v371_v13 = vadd.f32 %v2670_v52, %v370_v12  ;;  %2208 = vmatprep.mubr.f32.mxu1 %v415_v10  ;;  %v418_v14 = vmax.f32 %v376_v11, 0.0  ;;  %516 = vst.msk [vmem:[#allocation4 + $0xf0] sm:$0xff] %vm453_vm1, %v2448_v51  ;;  %517 = vst.msk [vmem:[#allocation4 + $0xf8] sm:$0xff] %vm453_vm1, %v2448_v51 }
 0x106   :  { %v2136_v15 = vpop.f32.mrf.mxu0  ;;  %2209 = vmatmul.mubr.f32.gmra.mxu1 %v416_v8 }
 0x107   :  { %v417_v16 = vmax.f32 %v371_v13, 0.0  ;;  %v386_v17 = vadd.f32 %v2136_v15, %v2670_v52 }
 0x108   :  { %v380_v18 = vpop.f32.mrf.mxu0 }
 0x109   :  { %v381_v19 = vadd.f32 %v2670_v52, %v380_v18  ;;  %2211 = vmatprep.mubr.f32.mxu1 %v417_v16  ;;  %v420_v20 = vmax.f32 %v386_v17, 0.0  ;;  %v2739_v52 = vld [vmem:[%s3708_s4] ss:$0 sm:$0xff] }
 0x10a   :  { %2212 = vmatmul.mubr.f32.gmra.mxu1 %v418_v14 }
 0x10b   :  { %v419_v21 = vmax.f32 %v381_v19, 0.0 }
 0x10d   :  { %2214 = vmatprep.mubr.f32.mxu1 %v419_v21 }
 0x10e   :  { %2215 = vmatmul.mubr.f32.gmra.mxu1 %v420_v20 }
 0x192   :  { %v2171_v23 = vpop.f32.mrf.mxu0 }
 0x193   :  { %v2742_v24 = vadd.f32 %v2171_v23, %v2739_v52 }
 0x194   :  { %v639_v25 = vpop.f32.mrf.mxu0 }
 0x195   :  { %803 = vst [vmem:[%s3709_s5 + $0x8] sm:$0xff] %v2742_v24  ;;  %v2749_v26 = vadd.f32 %v2739_v52, %v639_v25  ;;  %868 = vmax.xlane.f32.xlu0 %v2742_v24 }
 0x196   :  { %v2174_v27 = vpop.f32.mrf.mxu0 }
 0x197   :  { %802 = vst [vmem:[%s3709_s5] sm:$0xff] %v2749_v26  ;;  %v2757_v28 = vadd.f32 %v2174_v27, %v2739_v52 }
 0x198   :  { %v649_v29 = vpop.f32.mrf.mxu0 }
 0x199   :  { %805 = vst [vmem:[%s3709_s5 + $0x18] sm:$0xff] %v2757_v28  ;;  %v2764_v30 = vadd.f32 %v2739_v52, %v649_v29  ;;  %872 = vmax.xlane.f32.xlu1 %v2757_v28  ;;  %866 = vmax.xlane.f32.xlu0 %v2749_v26  ;;  %v3029_v29 = vld [vmem:[#allocation3 + $0x8] sm:$0xff] }
 0x19a   :  { %v2177_v31 = vpop.f32.mrf.mxu0 }
 0x19b   :  { %804 = vst [vmem:[%s3709_s5 + $0x10] sm:$0xff] %v2764_v30  ;;  %v2773_v32 = vadd.f32 %v2177_v31, %v2739_v52 }
 0x19c   :  { %v659_v33 = vpop.f32.mrf.mxu0 }
 0x19d   :  { %807 = vst [vmem:[%s3709_s5 + $0x28] sm:$0xff] %v2773_v32  ;;  %v2780_v34 = vadd.f32 %v2739_v52, %v659_v33  ;;  %870 = vmax.xlane.f32.xlu1 %v2764_v30 }
 0x19e   :  { %v2180_v35 = vpop.f32.mrf.mxu1 }
 0x19f   :  { %806 = vst [vmem:[%s3709_s5 + $0x20] sm:$0xff] %v2780_v34  ;;  %874 = vmax.xlane.f32.xlu0 %v2780_v34  ;;  %v2789_v36 = vadd.f32 %v2180_v35, %v2739_v52  ;;  %v3034_v35 = vld [vmem:[#allocation3 + $0x18] sm:$0xff] }
 0x1a0   :  { %v669_v37 = vpop.f32.mrf.mxu1 }
 0x1a1   :  { %809 = vst [vmem:[%s3709_s5 + $0x38] sm:$0xff] %v2789_v36  ;;  %876 = vmax.xlane.f32.xlu1 %v2773_v32  ;;  %v2797_v39 = vadd.f32 %v2739_v52, %v669_v37  ;;  %v3036_v37 = vld [vmem:[#allocation3] sm:$0xff] }
 0x1a2   :  { %v2183_v40 = vpop.f32.mrf.mxu1 }
 0x1a3   :  { %808 = vst [vmem:[%s3709_s5 + $0x30] sm:$0xff] %v2797_v39  ;;  %v2804_v41 = vadd.f32 %v2183_v40, %v2739_v52  ;;  %878 = vmax.xlane.f32.xlu0 %v2797_v39 }
 0x1a4   :  { %v679_v42 = vpop.f32.mrf.mxu1 }
 0x1a5   :  { %880 = vmax.xlane.f32.xlu1 %v2789_v36  ;;  %811 = vst [vmem:[%s3709_s5 + $0x48] sm:$0xff] %v2804_v41  ;;  %v2813_v43 = vadd.f32 %v2739_v52, %v679_v42 }
 0x1a6   :  { %v2186_v44 = vpop.f32.mrf.mxu1 }
 0x1a7   :  { %810 = vst [vmem:[%s3709_s5 + $0x40] sm:$0xff] %v2813_v43  ;;  %v2820_v45 = vadd.f32 %v2186_v44, %v2739_v52  ;;  %882 = vmax.xlane.f32.xlu0 %v2813_v43 }
 0x1a8   :  { %v689_v46 = vpop.f32.mrf.mxu1 }
 0x1a9   :  { %884 = vmax.xlane.f32.xlu1 %v2804_v41  ;;  %813 = vst [vmem:[%s3709_s5 + $0x58] sm:$0xff] %v2820_v45  ;;  %v2829_v47 = vadd.f32 %v2739_v52, %v689_v46  ;;  %v3049_v46 = vld [vmem:[#allocation3 + $0x10] sm:$0xff] }
 0x1aa   :  { %v2189_v48 = vpop.f32.mrf.mxu1 }
 0x1ab   :  { %812 = vst [vmem:[%s3709_s5 + $0x50] sm:$0xff] %v2829_v47  ;;  %v2836_v49 = vadd.f32 %v2189_v48, %v2739_v52  ;;  %886 = vmax.xlane.f32.xlu0 %v2829_v47  ;;  %v3154_v48 = vld [vmem:[#allocation3 + $0x70] sm:$0xff] }
 0x1ac   :  { %v699_v50 = vpop.f32.mrf.mxu1  ;;  %3765 = vst [vmem:[#allocation14_spill] sm:$0xff] %v3154_v48 }
 0x1ad   :  { %888 = vmax.xlane.f32.xlu1 %v2820_v45  ;;  %815 = vst [vmem:[%s3709_s5 + $0x68] sm:$0xff] %v2836_v49  ;;  %v2877_v53 = vadd.f32 %v2739_v52, %v699_v50  ;;  %v3163_v50 = vld [vmem:[#allocation3 + $0x78] sm:$0xff] }
 0x1ae   :  { %v2192_v54 = vpop.f32.mrf.mxu1  ;;  %3767 = vst [vmem:[#allocation16_spill] sm:$0xff] %v3163_v50 }
 0x1af   :  { %814 = vst [vmem:[%s3709_s5 + $0x60] sm:$0xff] %v2877_v53  ;;  %v2884_v55 = vadd.f32 %v2192_v54, %v2739_v52  ;;  %890 = vmax.xlane.f32.xlu0 %v2877_v53  ;;  %v3061_v54 = vld [vmem:[#allocation3 + $0x20] sm:$0xff] }
 0x1b0   :  { %v709_v56 = vpop.f32.mrf.mxu1 }
 0x1b1   :  { %892 = vmax.xlane.f32.xlu1 %v2836_v49  ;;  %817 = vst [vmem:[%s3709_s5 + $0x78] sm:$0xff] %v2884_v55  ;;  %v2893_v57 = vadd.f32 %v2739_v52, %v709_v56 }
 0x1b2   :  { %v2195_v58 = vpop.f32.mrf.mxu1 }
 0x1b3   :  { %816 = vst [vmem:[%s3709_s5 + $0x70] sm:$0xff] %v2893_v57  ;;  %v2900_v59 = vadd.f32 %v2195_v58, %v2739_v52  ;;  %894 = vmax.xlane.f32.xlu0 %v2893_v57 }
 0x1b4   :  { %v719_v60 = vpop.f32.mrf.mxu1 }
 0x1b5   :  { %896 = vmax.xlane.f32.xlu1 %v2884_v55  ;;  %819 = vst [vmem:[%s3709_s5 + $0x88] sm:$0xff] %v2900_v59  ;;  %v2909_v61 = vadd.f32 %v2739_v52, %v719_v60  ;;  %v3066_v60 = vld [vmem:[#allocation3 + $0x28] sm:$0xff] }
 0x1b6   :  { %v2198_v62 = vpop.f32.mrf.mxu1 }
 0x1b7   :  { %818 = vst [vmem:[%s3709_s5 + $0x80] sm:$0xff] %v2909_v61  ;;  %v2916_v63 = vadd.f32 %v2198_v62, %v2739_v52  ;;  %898 = vmax.xlane.f32.xlu0 %v2909_v61 }
 0x1b8   :  { %v729_v0 = vpop.f32.mrf.mxu1 }
 0x1b9   :  { %900 = vmax.xlane.f32.xlu1 %v2900_v59  ;;  %821 = vst [vmem:[%s3709_s5 + $0x98] sm:$0xff] %v2916_v63  ;;  %v2925_v1 = vadd.f32 %v2739_v52, %v729_v0 }
 0x1ba   :  { %v2201_v2 = vpop.f32.mrf.mxu1 }
 0x1bb   :  { %820 = vst [vmem:[%s3709_s5 + $0x90] sm:$0xff] %v2925_v1  ;;  %v2932_v3 = vadd.f32 %v2201_v2, %v2739_v52  ;;  %902 = vmax.xlane.f32.xlu0 %v2925_v1 }
 0x1bc   :  { %v739_v4 = vpop.f32.mrf.mxu1 }
 0x1bd   :  { %904 = vmax.xlane.f32.xlu1 %v2916_v63  ;;  %823 = vst [vmem:[%s3709_s5 + $0xa8] sm:$0xff] %v2932_v3  ;;  %v2941_v5 = vadd.f32 %v2739_v52, %v739_v4  ;;  %v3076_v4 = vld [vmem:[#allocation3 + $0x30] sm:$0xff] }
 0x1be   :  { %v2204_v6 = vpop.f32.mrf.mxu1 }
 0x1bf   :  { %822 = vst [vmem:[%s3709_s5 + $0xa0] sm:$0xff] %v2941_v5  ;;  %v2948_v7 = vadd.f32 %v2204_v6, %v2739_v52  ;;  %906 = vmax.xlane.f32.xlu0 %v2941_v5  ;;  %v3143_v6 = vld [vmem:[#allocation3 + $0x68] sm:$0xff] }
 0x1c0   :  { %v749_v8 = vpop.f32.mrf.mxu1  ;;  %3763 = vst [vmem:[#allocation12_spill] sm:$0xff] %v3143_v6 }
 0x1c1   :  { %908 = vmax.xlane.f32.xlu1 %v2932_v3  ;;  %825 = vst [vmem:[%s3709_s5 + $0xb8] sm:$0xff] %v2948_v7  ;;  %v2957_v9 = vadd.f32 %v2739_v52, %v749_v8 }
 0x1c2   :  { %v2207_v10 = vpop.f32.mrf.mxu1 }
 0x1c3   :  { %824 = vst [vmem:[%s3709_s5 + $0xb0] sm:$0xff] %v2957_v9  ;;  %v2964_v11 = vadd.f32 %v2207_v10, %v2739_v52  ;;  %910 = vmax.xlane.f32.xlu0 %v2957_v9  ;;  %v3085_v10 = vld [vmem:[#allocation3 + $0x38] sm:$0xff] }
 0x1c4   :  { %v759_v12 = vpop.f32.mrf.mxu1 }
 0x1c5   :  { %912 = vmax.xlane.f32.xlu1 %v2948_v7  ;;  %827 = vst [vmem:[%s3709_s5 + $0xc8] sm:$0xff] %v2964_v11  ;;  %v2973_v13 = vadd.f32 %v2739_v52, %v759_v12 }
 0x1c6   :  { %v2210_v14 = vpop.f32.mrf.mxu1 }
 0x1c7   :  { %826 = vst [vmem:[%s3709_s5 + $0xc0] sm:$0xff] %v2973_v13  ;;  %v2980_v15 = vadd.f32 %v2210_v14, %v2739_v52  ;;  %914 = vmax.xlane.f32.xlu0 %v2973_v13 }
 0x1c8   :  { %v769_v16 = vpop.f32.mrf.mxu1 }
 0x1c9   :  { %916 = vmax.xlane.f32.xlu1 %v2964_v11  ;;  %829 = vst [vmem:[%s3709_s5 + $0xd8] sm:$0xff] %v2980_v15  ;;  %v2989_v17 = vadd.f32 %v2739_v52, %v769_v16 }
 0x1ca   :  { %v2213_v18 = vpop.f32.mrf.mxu1 }
 0x1cb   :  { %828 = vst [vmem:[%s3709_s5 + $0xd0] sm:$0xff] %v2989_v17  ;;  %v2996_v19 = vadd.f32 %v2213_v18, %v2739_v52  ;;  %918 = vmax.xlane.f32.xlu0 %v2989_v17 }
 0x1cc   :  { %v779_v20 = vpop.f32.mrf.mxu1 }
 0x1cd   :  { %920 = vmax.xlane.f32.xlu1 %v2980_v15  ;;  %831 = vst [vmem:[%s3709_s5 + $0xe8] sm:$0xff] %v2996_v19  ;;  %v3005_v21 = vadd.f32 %v2739_v52, %v779_v20  ;;  %v3095_v20 = vld [vmem:[#allocation3 + $0x40] sm:$0xff] }
 0x1ce   :  { %v2216_v22 = vpop.f32.mrf.mxu1  ;;  %3756 = vst [vmem:[#allocation5_spill] sm:$0xff] %v3095_v20 }
 0x1cf   :  { %830 = vst [vmem:[%s3709_s5 + $0xe0] sm:$0xff] %v3005_v21  ;;  %v3012_v23 = vadd.f32 %v2216_v22, %v2739_v52  ;;  %922 = vmax.xlane.f32.xlu0 %v3005_v21 }
 0x1d0   :  { %v789_v25 = vpop.f32.mrf.mxu1 }
 0x1d1   :  { %924 = vmax.xlane.f32.xlu1 %v2996_v19  ;;  %833 = vst [vmem:[%s3709_s5 + $0xf8] sm:$0xff] %v3012_v23  ;;  %v3021_v27 = vadd.f32 %v2739_v52, %v789_v25  ;;  %v3123_v25 = vld [vmem:[#allocation3 + $0x58] sm:$0xff] }
 0x1d2   :  { %3759 = vst [vmem:[#allocation8_spill] sm:$0xff] %v3123_v25 }
 0x1d3   :  { %832 = vst [vmem:[%s3709_s5 + $0xf0] sm:$0xff] %v3021_v27  ;;  %926 = vmax.xlane.f32.xlu0 %v3021_v27 }
 0x1d5   :  { %928 = vmax.xlane.f32.xlu1 %v3012_v23 }
 0x21e   :  { %v869_v31 = vpop.xlane.xlu0 %868 }
 0x21f   :  { %v3032_v33 = vmax.f32 %v3029_v29, %v869_v31  ;;  %v3104_v31 = vld [vmem:[#allocation3 + $0x48] sm:$0xff] }
 0x221   :  { %1508 = vst.msk [vmem:[#allocation3 + $0x8] sm:$0xff] %vm453_vm1, %v3032_v33  ;;  %1129 = vperm.xlu1 %2252, %v3032_v33  }
 0x222   :  { %v873_v38 = vpop.xlane.xlu1 %872  ;;  %v867_v40 = vpop.xlane.xlu0 %866 }
 0x223   :  { %v3044_v42 = vmax.f32 %v3034_v35, %v873_v38  ;;  %v3047_v44 = vmax.f32 %v3036_v37, %v867_v40 }
 0x225   :  { %1510 = vst.msk [vmem:[#allocation3 + $0x18] sm:$0xff] %vm453_vm1, %v3044_v42  ;;  %1507 = vst.msk [vmem:[#allocation3] sm:$0xff] %vm453_vm1, %v3047_v44  ;;  %1139 = vperm.xlu1 %2252, %v3044_v42   ;;  %1124 = vperm.xlu0 %2253, %v3047_v44  }
 0x226   :  { %v871_v51 = vpop.xlane.xlu1 %870 }
 0x227   :  { %v3064_v56 = vmax.f32 %v3049_v46, %v871_v51 }
 0x228   :  { %v875_v58 = vpop.xlane.xlu0 %874 }
 0x229   :  { %1509 = vst.msk [vmem:[#allocation3 + $0x10] sm:$0xff] %vm453_vm1, %v3064_v56  ;;  %v3073_v0 = vmax.f32 %v3061_v54, %v875_v58  ;;  %1134 = vperm.xlu1 %2252, %v3064_v56  }
 0x22a   :  { %v877_v2 = vpop.xlane.xlu1 %876 }
 0x22b   :  { %1511 = vst.msk [vmem:[#allocation3 + $0x20] sm:$0xff] %vm453_vm1, %v3073_v0  ;;  %v3083_v8 = vmax.f32 %v3066_v60, %v877_v2  ;;  %v3114_v2 = vld [vmem:[#allocation3 + $0x50] sm:$0xff] }
 0x22c   :  { %v879_v12 = vpop.xlane.xlu0 %878  ;;  %3758 = vst [vmem:[#allocation7_spill] sm:$0xff] %v3114_v2 }
 0x22d   :  { %1512 = vst.msk [vmem:[#allocation3 + $0x28] sm:$0xff] %vm453_vm1, %v3083_v8  ;;  %1149 = vperm.xlu1 %2252, %v3083_v8   ;;  %v3093_v16 = vmax.f32 %v3076_v4, %v879_v12 }
 0x22e   :  { %v881_v18 = vpop.xlane.xlu1 %880 }
 0x22f   :  { %v3098_v22 = vmax.f32 %v3085_v10, %v881_v18  ;;  %1513 = vst.msk [vmem:[#allocation3 + $0x30] sm:$0xff] %vm453_vm1, %v3093_v16  ;;  %v3134_v18 = vld [vmem:[#allocation3 + $0x60] sm:$0xff] }
 0x230   :  { %v883_v38 = vpop.xlane.xlu0 %882  ;;  %3761 = vst [vmem:[#allocation10_spill] sm:$0xff] %v3134_v18 }
 0x231   :  { %1514 = vst.msk [vmem:[#allocation3 + $0x38] sm:$0xff] %vm453_vm1, %v3098_v22  ;;  %1144 = vperm.xlu1 %2252, %v3073_v0   ;;  %v3112_v51 = vmax.f32 %v3095_v20, %v883_v38  ;;  %v3194_v20 = vld [vmem:[#allocation3 + $0x90] sm:$0xff] }
 0x232   :  { %v885_v58 = vpop.xlane.xlu1 %884  ;;  %3773 = vst [vmem:[#allocation22_spill] sm:$0xff] %v3194_v20 }
 0x233   :  { %3757 = vst [vmem:[#allocation6_spill] sm:$0xff] %v3112_v51  ;;  %v3117_v12 = vmax.f32 %v3104_v31, %v885_v58  ;;  %1515 = vst.msk [vmem:[#allocation3 + $0x40] sm:$0xff] %vm453_vm1, %v3112_v51 }
 0x234   :  { %v887_v40 = vpop.xlane.xlu0 %886 }
 0x235   :  { %1516 = vst.msk [vmem:[#allocation3 + $0x48] sm:$0xff] %vm453_vm1, %v3117_v12  ;;  %1169 = vperm.xlu0 %2253, %v3117_v12   ;;  %1159 = vperm.xlu1 %2252, %v3098_v22   ;;  %v3132_v38 = vmax.f32 %v3114_v2, %v887_v40  ;;  %v3174_v2 = vld [vmem:[#allocation3 + $0x80] sm:$0xff] }
 0x236   :  { %v889_v58 = vpop.xlane.xlu1 %888  ;;  %3769 = vst [vmem:[#allocation18_spill] sm:$0xff] %v3174_v2 }
 0x237   :  { %3760 = vst [vmem:[#allocation9_spill] sm:$0xff] %v3132_v38  ;;  %v3137_v14 = vmax.f32 %v3123_v25, %v889_v58  ;;  %1517 = vst.msk [vmem:[#allocation3 + $0x50] sm:$0xff] %vm453_vm1, %v3132_v38  ;;  %v3183_v25 = vld [vmem:[#allocation3 + $0x88] sm:$0xff] }
 0x238   :  { %v891_v62 = vpop.xlane.xlu0 %890  ;;  %3771 = vst [vmem:[#allocation20_spill] sm:$0xff] %v3183_v25 }
 0x239   :  { %3762 = vst [vmem:[#allocation11_spill] sm:$0xff] %v3137_v14  ;;  %1518 = vst.msk [vmem:[#allocation3 + $0x58] sm:$0xff] %vm453_vm1, %v3137_v14  ;;  %1179 = vperm.xlu0 %2253, %v3137_v14   ;;  %1154 = vperm.xlu1 %2252, %v3093_v16   ;;  %v3152_v40 = vmax.f32 %v3134_v18, %v891_v62 }
 0x23a   :  { %v893_v58 = vpop.xlane.xlu1 %892 }
 0x23b   :  { %3764 = vst [vmem:[#allocation13_spill] sm:$0xff] %v3152_v40  ;;  %v3157_v52 = vmax.f32 %v3143_v6, %v893_v58  ;;  %1519 = vst.msk [vmem:[#allocation3 + $0x60] sm:$0xff] %vm453_vm1, %v3152_v40  ;;  %v3203_v6 = vld [vmem:[#allocation3 + $0x98] sm:$0xff] }
 0x23c   :  { %v895_v14 = vpop.xlane.xlu0 %894  ;;  %3775 = vst [vmem:[#allocation24_spill] sm:$0xff] %v3203_v6 }
 0x23d   :  { %3766 = vst [vmem:[#allocation15_spill] sm:$0xff] %v3157_v52  ;;  %1520 = vst.msk [vmem:[#allocation3 + $0x68] sm:$0xff] %vm453_vm1, %v3157_v52  ;;  %1189 = vperm.xlu0 %2253, %v3157_v52   ;;  %1164 = vperm.xlu1 %2252, %v3112_v51   ;;  %v3172_v62 = vmax.f32 %v3154_v48, %v895_v14  ;;  %v3214_v51 = vld [vmem:[#allocation3 + $0xa0] sm:$0xff] }
 0x23e   :  { %v897_v58 = vpop.xlane.xlu1 %896  ;;  %3777 = vst [vmem:[#allocation26_spill] sm:$0xff] %v3214_v51 }
 0x23f   :  { %3768 = vst [vmem:[#allocation17_spill] sm:$0xff] %v3172_v62  ;;  %v3177_v18 = vmax.f32 %v3163_v50, %v897_v58  ;;  %1521 = vst.msk [vmem:[#allocation3 + $0x70] sm:$0xff] %vm453_vm1, %v3172_v62  ;;  %v3223_v50 = vld [vmem:[#allocation3 + $0xa8] sm:$0xff] }
 0x240   :  { %v899_v52 = vpop.xlane.xlu0 %898  ;;  %3779 = vst [vmem:[#allocation28_spill] sm:$0xff] %v3223_v50 }
 0x241   :  { %3770 = vst [vmem:[#allocation19_spill] sm:$0xff] %v3177_v18  ;;  %1522 = vst.msk [vmem:[#allocation3 + $0x78] sm:$0xff] %vm453_vm1, %v3177_v18  ;;  %1199 = vperm.xlu0 %2253, %v3177_v18   ;;  %1174 = vperm.xlu1 %2252, %v3132_v38   ;;  %v3192_v14 = vmax.f32 %v3174_v2, %v899_v52  ;;  %v3234_v38 = vld [vmem:[#allocation3 + $0xb0] sm:$0xff] }
 0x242   :  { %v901_v58 = vpop.xlane.xlu1 %900  ;;  %3781 = vst [vmem:[#allocation30_spill] sm:$0xff] %v3234_v38 }
 0x243   :  { %3772 = vst [vmem:[#allocation21_spill] sm:$0xff] %v3192_v14  ;;  %v3197_v48 = vmax.f32 %v3183_v25, %v901_v58  ;;  %1523 = vst.msk [vmem:[#allocation3 + $0x80] sm:$0xff] %vm453_vm1, %v3192_v14  ;;  %v3243_v25 = vld [vmem:[#allocation3 + $0xb8] sm:$0xff] }
 0x244   :  { %v903_v18 = vpop.xlane.xlu0 %902  ;;  %3783 = vst [vmem:[#allocation32_spill] sm:$0xff] %v3243_v25 }
 0x245   :  { %3774 = vst [vmem:[#allocation23_spill] sm:$0xff] %v3197_v48  ;;  %1524 = vst.msk [vmem:[#allocation3 + $0x88] sm:$0xff] %vm453_vm1, %v3197_v48  ;;  %1209 = vperm.xlu0 %2253, %v3197_v48   ;;  %1184 = vperm.xlu1 %2252, %v3152_v40   ;;  %v3212_v52 = vmax.f32 %v3194_v20, %v903_v18  ;;  %v3254_v40 = vld [vmem:[#allocation3 + $0xc0] sm:$0xff] }
 0x246   :  { %v905_v58 = vpop.xlane.xlu1 %904  ;;  %3785 = vst [vmem:[#allocation34_spill] sm:$0xff] %v3254_v40 }
 0x247   :  { %3776 = vst [vmem:[#allocation25_spill] sm:$0xff] %v3212_v52  ;;  %v3217_v2 = vmax.f32 %v3203_v6, %v905_v58  ;;  %1525 = vst.msk [vmem:[#allocation3 + $0x90] sm:$0xff] %vm453_vm1, %v3212_v52  ;;  %v3263_v6 = vld [vmem:[#allocation3 + $0xc8] sm:$0xff] }
 0x248   :  { %v907_v48 = vpop.xlane.xlu0 %906  ;;  %3787 = vst [vmem:[#allocation36_spill] sm:$0xff] %v3263_v6 }
 0x249   :  { %3778 = vst [vmem:[#allocation27_spill] sm:$0xff] %v3217_v2  ;;  %1526 = vst.msk [vmem:[#allocation3 + $0x98] sm:$0xff] %vm453_vm1, %v3217_v2  ;;  %1219 = vperm.xlu0 %2253, %v3217_v2   ;;  %1194 = vperm.xlu1 %2252, %v3172_v62   ;;  %v3232_v18 = vmax.f32 %v3214_v51, %v907_v48  ;;  %v3274_v62 = vld [vmem:[#allocation3 + $0xd0] sm:$0xff] }
 0x24a   :  { %v909_v58 = vpop.xlane.xlu1 %908  ;;  %3789 = vst [vmem:[#allocation38_spill] sm:$0xff] %v3274_v62 }
 0x24b   :  { %3780 = vst [vmem:[#allocation29_spill] sm:$0xff] %v3232_v18  ;;  %v3237_v20 = vmax.f32 %v3223_v50, %v909_v58  ;;  %1527 = vst.msk [vmem:[#allocation3 + $0xa0] sm:$0xff] %vm453_vm1, %v3232_v18  ;;  %v3283_v50 = vld [vmem:[#allocation3 + $0xd8] sm:$0xff] }
 0x24c   :  { %v911_v2 = vpop.xlane.xlu0 %910  ;;  %3791 = vst [vmem:[#allocation40_spill] sm:$0xff] %v3283_v50 }
 0x24d   :  { %3782 = vst [vmem:[#allocation31_spill] sm:$0xff] %v3237_v20  ;;  %1528 = vst.msk [vmem:[#allocation3 + $0xa8] sm:$0xff] %vm453_vm1, %v3237_v20  ;;  %1229 = vperm.xlu0 %2253, %v3237_v20   ;;  %1204 = vperm.xlu1 %2252, %v3192_v14   ;;  %v3252_v48 = vmax.f32 %v3234_v38, %v911_v2  ;;  %v3294_v14 = vld [vmem:[#allocation3 + $0xe0] sm:$0xff] }
 0x24e   :  { %v913_v58 = vpop.xlane.xlu1 %912  ;;  %3793 = vst [vmem:[#allocation42_spill] sm:$0xff] %v3294_v14 }
 0x24f   :  { %3784 = vst [vmem:[#allocation33_spill] sm:$0xff] %v3252_v48  ;;  %v3257_v51 = vmax.f32 %v3243_v25, %v913_v58  ;;  %1529 = vst.msk [vmem:[#allocation3 + $0xb0] sm:$0xff] %vm453_vm1, %v3252_v48  ;;  %v3303_v25 = vld [vmem:[#allocation3 + $0xe8] sm:$0xff] }
 0x250   :  { %v915_v20 = vpop.xlane.xlu0 %914  ;;  %3795 = vst [vmem:[#allocation44_spill] sm:$0xff] %v3303_v25 }
 0x251   :  { %3786 = vst [vmem:[#allocation35_spill] sm:$0xff] %v3257_v51  ;;  %1530 = vst.msk [vmem:[#allocation3 + $0xb8] sm:$0xff] %vm453_vm1, %v3257_v51  ;;  %1239 = vperm.xlu0 %2253, %v3257_v51   ;;  %1214 = vperm.xlu1 %2252, %v3212_v52   ;;  %v3272_v2 = vmax.f32 %v3254_v40, %v915_v20  ;;  %v3314_v52 = vld [vmem:[#allocation3 + $0xf0] sm:$0xff] }
 0x252   :  { %v917_v58 = vpop.xlane.xlu1 %916  ;;  %3797 = vst [vmem:[#allocation46_spill] sm:$0xff] %v3314_v52 }
 0x253   :  { %3788 = vst [vmem:[#allocation37_spill] sm:$0xff] %v3272_v2  ;;  %v3277_v38 = vmax.f32 %v3263_v6, %v917_v58  ;;  %1531 = vst.msk [vmem:[#allocation3 + $0xc0] sm:$0xff] %vm453_vm1, %v3272_v2  ;;  %v3323_v6 = vld [vmem:[#allocation3 + $0xf8] sm:$0xff] }
 0x254   :  { %v919_v51 = vpop.xlane.xlu0 %918  ;;  %3799 = vst [vmem:[#allocation48_spill] sm:$0xff] %v3323_v6 }
 0x255   :  { %3790 = vst [vmem:[#allocation39_spill] sm:$0xff] %v3277_v38  ;;  %1532 = vst.msk [vmem:[#allocation3 + $0xc8] sm:$0xff] %vm453_vm1, %v3277_v38  ;;  %1249 = vperm.xlu0 %2253, %v3277_v38   ;;  %1224 = vperm.xlu1 %2252, %v3232_v18   ;;  %v3292_v20 = vmax.f32 %v3274_v62, %v919_v51 }
 0x256   :  { %v921_v58 = vpop.xlane.xlu1 %920 }
 0x257   :  { %3792 = vst [vmem:[#allocation41_spill] sm:$0xff] %v3292_v20  ;;  %v3297_v40 = vmax.f32 %v3283_v50, %v921_v58  ;;  %1533 = vst.msk [vmem:[#allocation3 + $0xd0] sm:$0xff] %vm453_vm1, %v3292_v20 }
 0x258   :  { %v923_v38 = vpop.xlane.xlu0 %922 }
 0x259   :  { %3794 = vst [vmem:[#allocation43_spill] sm:$0xff] %v3297_v40  ;;  %1534 = vst.msk [vmem:[#allocation3 + $0xd8] sm:$0xff] %vm453_vm1, %v3297_v40  ;;  %1259 = vperm.xlu0 %2253, %v3297_v40   ;;  %1234 = vperm.xlu1 %2252, %v3252_v48   ;;  %v3312_v51 = vmax.f32 %v3294_v14, %v923_v38 }
 0x25a   :  { %v925_v58 = vpop.xlane.xlu1 %924 }
 0x25b   :  { %3796 = vst [vmem:[#allocation45_spill] sm:$0xff] %v3312_v51  ;;  %v3317_v62 = vmax.f32 %v3303_v25, %v925_v58  ;;  %1535 = vst.msk [vmem:[#allocation3 + $0xe0] sm:$0xff] %vm453_vm1, %v3312_v51 }
 0x25c   :  { %v927_v40 = vpop.xlane.xlu0 %926 }
 0x25d   :  { %3798 = vst [vmem:[#allocation47_spill] sm:$0xff] %v3317_v62  ;;  %1536 = vst.msk [vmem:[#allocation3 + $0xe8] sm:$0xff] %vm453_vm1, %v3317_v62  ;;  %1269 = vperm.xlu0 %2253, %v3317_v62   ;;  %1244 = vperm.xlu1 %2252, %v3272_v2   ;;  %v3332_v38 = vmax.f32 %v3314_v52, %v927_v40 }
 0x25e   :  { %v929_v58 = vpop.xlane.xlu1 %928 }
 0x25f   :  { %3800 = vst [vmem:[#allocation49_spill] sm:$0xff] %v3332_v38  ;;  %v3335_v18 = vmax.f32 %v3323_v6, %v929_v58  ;;  %1537 = vst.msk [vmem:[#allocation3 + $0xf0] sm:$0xff] %vm453_vm1, %v3332_v38 }
 0x261   :  { %3801 = vst [vmem:[#allocation50_spill] sm:$0xff] %v3335_v18  ;;  %1538 = vst.msk [vmem:[#allocation3 + $0xf8] sm:$0xff] %vm453_vm1, %v3335_v18  ;;  %1279 = vperm.xlu0 %2253, %v3335_v18   ;;  %1254 = vperm.xlu1 %2252, %v3292_v20  }
 0x265   :  { %1264 = vperm.xlu1 %2252, %v3312_v51  }
 0x269   :  { %1274 = vperm.xlu1 %2252, %v3332_v38  }
 0x29c   :  { %v1130_v40 = vpop.permute.xlu1 %1129 }
 0x29d   :  { %v1283_v58 = vsub.f32 %v2742_v24, %v1130_v40 }
 0x29f   :  { %v1316_v14 = vmul.f32 1.442695, %v1283_v58 }
 0x2a0   :  { %v1140_v52 = vpop.permute.xlu1 %1139  ;;  %v1125_v62 = vpop.permute.xlu0 %1124 }
 0x2a1   :  { %2254 = vpow2.f32 %v1316_v14  ;;  %v1282_v50 = vsub.f32 %v2749_v26, %v1125_v62  ;;  %v1285_v6 = vsub.f32 %v2757_v28, %v1140_v52 }
 0x2a3   :  { %v1314_v25 = vmul.f32 1.442695, %v1282_v50  ;;  %v1320_v20 = vmul.f32 1.442695, %v1285_v6 }
 0x2a4   :  { %v1135_v2 = vpop.permute.xlu1 %1134 }
 0x2a5   :  { %v1284_v18 = vsub.f32 %v2764_v30, %v1135_v2  ;;  %2256 = vpow2.f32 %v1314_v25 }
 0x2a7   :  { %v1318_v51 = vmul.f32 1.442695, %v1284_v18 }
 0x2a8   :  { %v1150_v48 = vpop.permute.xlu1 %1149 }
 0x2a9   :  { %2258 = vpow2.f32 %v1318_v51  ;;  %v1287_v38 = vsub.f32 %v2773_v32, %v1150_v48 }
 0x2aa   :  { %2260 = vpow2.f32 %v1320_v20 }
 0x2ab   :  { %v1324_v24 = vmul.f32 1.442695, %v1287_v38 }
 0x2ac   :  { %v1145_v40 = vpop.permute.xlu1 %1144 }
 0x2ad   :  { %2262 = vpow2.f32 %v1324_v24  ;;  %v1286_v14 = vsub.f32 %v2780_v34, %v1145_v40 }
 0x2ae   :  { %v2255_v26 = vpop.eup %2254 }
 0x2af   :  { %v1322_v62 = vmul.f32 1.442695, %v1286_v14  ;;  %1380 = vadd.xlane.f32.xlu0 %v2255_v26 }
 0x2b0   :  { %v1160_v28 = vpop.permute.xlu1 %1159  ;;  %v1170_v50 = vpop.permute.xlu0 %1169 }
 0x2b1   :  { %2264 = vpow2.f32 %v1322_v62  ;;  %v1289_v30 = vsub.f32 %v2789_v36, %v1160_v28  ;;  %v1291_v6 = vsub.f32 %v2804_v41, %v1170_v50 }
 0x2b2   :  { %v2257_v25 = vpop.eup %2256 }
 0x2b3   :  { %v1328_v52 = vmul.f32 1.442695, %v1289_v30  ;;  %v1332_v18 = vmul.f32 1.442695, %v1291_v6  ;;  %1378 = vadd.xlane.f32.xlu1 %v2257_v25 }
 0x2b4   :  { %v1155_v32 = vpop.permute.xlu1 %1154  ;;  %v1180_v48 = vpop.permute.xlu0 %1179 }
 0x2b5   :  { %2266 = vpow2.f32 %v1328_v52  ;;  %v1288_v2 = vsub.f32 %v2797_v39, %v1155_v32  ;;  %v1293_v34 = vsub.f32 %v2820_v45, %v1180_v48 }
 0x2b6   :  { %v2259_v20 = vpop.eup %2258  ;;  %2268 = vpow2.f32 %v1332_v18 }
 0x2b7   :  { %v2261_v51 = vpop.eup %2260  ;;  %v1326_v38 = vmul.f32 1.442695, %v1288_v2  ;;  %1382 = vadd.xlane.f32.xlu0 %v2259_v20  ;;  %v1336_v58 = vmul.f32 1.442695, %v1293_v34 }
 0x2b8   :  { %1384 = vadd.xlane.f32.xlu1 %v2261_v51  ;;  %v1165_v36 = vpop.permute.xlu1 %1164  ;;  %v1190_v41 = vpop.permute.xlu0 %1189 }
 0x2b9   :  { %2270 = vpow2.f32 %v1326_v38  ;;  %v1290_v24 = vsub.f32 %v2813_v43, %v1165_v36  ;;  %v1295_v40 = vsub.f32 %v2836_v49, %v1190_v41 }
 0x2ba   :  { %v2263_v14 = vpop.eup %2262  ;;  %2272 = vpow2.f32 %v1336_v58 }
 0x2bb   :  { %v1330_v26 = vmul.f32 1.442695, %v1290_v24  ;;  %v1340_v39 = vmul.f32 1.442695, %v1295_v40 }
 0x2bc   :  { %1388 = vadd.xlane.f32.xlu1 %v2263_v14  ;;  %v1175_v45 = vpop.permute.xlu1 %1174  ;;  %v1200_v62 = vpop.permute.xlu0 %1199 }
 0x2bd   :  { %2274 = vpow2.f32 %v1330_v26  ;;  %v1292_v28 = vsub.f32 %v2829_v47, %v1175_v45  ;;  %v1297_v50 = vsub.f32 %v2884_v55, %v1200_v62 }
 0x2be   :  { %v2265_v30 = vpop.eup %2264  ;;  %2276 = vpow2.f32 %v1340_v39 }
 0x2bf   :  { %v1334_v6 = vmul.f32 1.442695, %v1292_v28  ;;  %1386 = vadd.xlane.f32.xlu0 %v2265_v30  ;;  %v1344_v25 = vmul.f32 1.442695, %v1297_v50 }
 0x2c0   :  { %v1185_v43 = vpop.permute.xlu1 %1184  ;;  %v1210_v52 = vpop.permute.xlu0 %1209 }
 0x2c1   :  { %2278 = vpow2.f32 %v1334_v6  ;;  %v1294_v49 = vsub.f32 %v2877_v53, %v1185_v43  ;;  %v1299_v18 = vsub.f32 %v2900_v59, %v1210_v52 }
 0x2c2   :  { %v2267_v32 = vpop.eup %2266  ;;  %2280 = vpow2.f32 %v1344_v25 }
 0x2c3   :  { %v1338_v48 = vmul.f32 1.442695, %v1294_v49  ;;  %1392 = vadd.xlane.f32.xlu1 %v2267_v32  ;;  %v1348_v2 = vmul.f32 1.442695, %v1299_v18  ;;  %v2269_v55 = vpop.eup %2268 }
 0x2c4   :  { %v1195_v47 = vpop.permute.xlu1 %1194  ;;  %v1220_v34 = vpop.permute.xlu0 %1219 }
 0x2c5   :  { %2282 = vpow2.f32 %v1338_v48  ;;  %v1296_v20 = vsub.f32 %v2893_v57, %v1195_v47  ;;  %v1301_v51 = vsub.f32 %v2916_v63, %v1220_v34 }
 0x2c6   :  { %v2271_v38 = vpop.eup %2270  ;;  %2284 = vpow2.f32 %v1348_v2 }
 0x2c7   :  { %v1342_v58 = vmul.f32 1.442695, %v1296_v20  ;;  %1390 = vadd.xlane.f32.xlu0 %v2271_v38  ;;  %1396 = vadd.xlane.f32.xlu1 %v2269_v55  ;;  %v1352_v53 = vmul.f32 1.442695, %v1301_v51  ;;  %v2273_v41 = vpop.eup %2272 }
 0x2c8   :  { %v1205_v59 = vpop.permute.xlu1 %1204  ;;  %v1230_v36 = vpop.permute.xlu0 %1229 }
 0x2c9   :  { %2286 = vpow2.f32 %v1342_v58  ;;  %v1298_v24 = vsub.f32 %v2909_v61, %v1205_v59  ;;  %v1303_v40 = vsub.f32 %v2932_v3, %v1230_v36 }
 0x2ca   :  { %v2275_v14 = vpop.eup %2274  ;;  %2288 = vpow2.f32 %v1352_v53 }
 0x2cb   :  { %v1346_v26 = vmul.f32 1.442695, %v1298_v24  ;;  %1394 = vadd.xlane.f32.xlu0 %v2275_v14  ;;  %1400 = vadd.xlane.f32.xlu1 %v2273_v41  ;;  %v1356_v57 = vmul.f32 1.442695, %v1303_v40  ;;  %v2277_v45 = vpop.eup %2276 }
 0x2cc   :  { %v1215_v63 = vpop.permute.xlu1 %1214  ;;  %v1240_v39 = vpop.permute.xlu0 %1239 }
 0x2cd   :  { %2290 = vpow2.f32 %v1346_v26  ;;  %v1300_v62 = vsub.f32 %v2925_v1, %v1215_v63  ;;  %v1305_v28 = vsub.f32 %v2948_v7, %v1240_v39 }
 0x2ce   :  { %v2279_v50 = vpop.eup %2278  ;;  %2292 = vpow2.f32 %v1356_v57 }
 0x2cf   :  { %v1350_v30 = vmul.f32 1.442695, %v1300_v62  ;;  %1398 = vadd.xlane.f32.xlu0 %v2279_v50  ;;  %1404 = vadd.xlane.f32.xlu1 %v2277_v45  ;;  %v1360_v61 = vmul.f32 1.442695, %v1305_v28  ;;  %v2281_v25 = vpop.eup %2280 }
 0x2d0   :  { %v1225_v3 = vpop.permute.xlu1 %1224  ;;  %v1250_v6 = vpop.permute.xlu0 %1249 }
 0x2d1   :  { %2294 = vpow2.f32 %v1350_v30  ;;  %v1302_v43 = vsub.f32 %v2941_v5, %v1225_v3  ;;  %v1307_v52 = vsub.f32 %v2964_v11, %v1250_v6 }
 0x2d2   :  { %v2283_v49 = vpop.eup %2282  ;;  %2296 = vpow2.f32 %v1360_v61 }
 0x2d3   :  { %v1354_v18 = vmul.f32 1.442695, %v1302_v43  ;;  %1402 = vadd.xlane.f32.xlu0 %v2283_v49  ;;  %1408 = vadd.xlane.f32.xlu1 %v2281_v25  ;;  %v1364_v1 = vmul.f32 1.442695, %v1307_v52  ;;  %v2285_v48 = vpop.eup %2284  ;;  %v3803_v49 = vsub.f32 %v3036_v37, %v3047_v44 }
 0x2d4   :  { %v1235_v7 = vpop.permute.xlu1 %1234  ;;  %v1260_v32 = vpop.permute.xlu0 %1259 }
 0x2d5   :  { %2298 = vpow2.f32 %v1354_v18  ;;  %v1304_v2 = vsub.f32 %v2957_v9, %v1235_v7  ;;  %v1309_v47 = vsub.f32 %v2980_v15, %v1260_v32  ;;  %v1026_v18 = vmul.f32 1.442695, %v3803_v49  ;;  %v3827_v49 = vld [vmem:[#allocation19_spill] sm:$0xff] }
 0x2d6   :  { %v2287_v34 = vpop.eup %2286  ;;  %2300 = vpow2.f32 %v1364_v1  ;;  %v3804_v1 = vsub.f32 %v3049_v46, %v3064_v56  ;;  %v3805_v32 = vsub.f32 %v3034_v35, %v3044_v42  ;;  %v3808_v46 = vsub.f32 %v3085_v10, %v3098_v22  ;;  %v964_v10 = vld [vmem:[#allocation4 + $0x10] sm:$0xff] }
 0x2d7   :  { %v1358_v55 = vmul.f32 1.442695, %v1304_v2  ;;  %1406 = vadd.xlane.f32.xlu0 %v2287_v34  ;;  %1412 = vadd.xlane.f32.xlu1 %v2285_v48  ;;  %v1368_v5 = vmul.f32 1.442695, %v1309_v47  ;;  %v2289_v51 = vpop.eup %2288  ;;  %v3807_v2 = vsub.f32 %v3061_v54, %v3073_v0  ;;  %v963_v47 = vld [vmem:[#allocation4 + $0x8] sm:$0xff]  ;;  %v3810_v54 = vsub.f32 %v3104_v31, %v3117_v12 }
 0x2d8   :  { %v1245_v11 = vpop.permute.xlu1 %1244  ;;  %v1270_v20 = vpop.permute.xlu0 %1269  ;;  %v1030_v7 = vmul.f32 1.442695, %v3804_v1  ;;  %v1032_v48 = vmul.f32 1.442695, %v3805_v32  ;;  %v1040_v35 = vmul.f32 1.442695, %v3808_v46 }
 0x2d9   :  { %2302 = vpow2.f32 %v1358_v55  ;;  %v1306_v38 = vsub.f32 %v2973_v13, %v1245_v11  ;;  %v1311_v58 = vsub.f32 %v2996_v19, %v1270_v20  ;;  %v1034_v37 = vmul.f32 1.442695, %v3807_v2  ;;  %v969_v2 = vld [vmem:[#allocation4 + $0x38] sm:$0xff] }
 0x2da   :  { %v2291_v53 = vpop.eup %2290  ;;  %2304 = vpow2.f32 %v1368_v5  ;;  %v962_v5 = vld [vmem:[#allocation4] sm:$0xff]  ;;  %v1044_v0 = vmul.f32 1.442695, %v3810_v54  ;;  %v3836_v54 = vld [vmem:[#allocation23_spill] sm:$0xff] }
 0x2db   :  { %v1362_v59 = vmul.f32 1.442695, %v1306_v38  ;;  %1410 = vadd.xlane.f32.xlu0 %v2291_v53  ;;  %1416 = vadd.xlane.f32.xlu1 %v2289_v51  ;;  %v1372_v9 = vmul.f32 1.442695, %v1311_v58  ;;  %v2293_v41 = vpop.eup %2292  ;;  %v3811_v51 = vld [vmem:[#allocation5_spill] sm:$0xff]  ;;  %v3812_v38 = vld [vmem:[#allocation6_spill] sm:$0xff] }
 0x2dc   :  { %v1255_v15 = vpop.permute.xlu1 %1254  ;;  %v1280_v36 = vpop.permute.xlu0 %1279  ;;  %v3813_v58 = vsub.f32 %v3811_v51, %v3812_v38  ;;  %v971_v38 = vld [vmem:[#allocation4 + $0x48] sm:$0xff] }
 0x2dd   :  { %2306 = vpow2.f32 %v1362_v59  ;;  %v1308_v24 = vsub.f32 %v2989_v17, %v1255_v15  ;;  %v1313_v40 = vsub.f32 %v3012_v23, %v1280_v36 }
 0x2de   :  { %v2295_v14 = vpop.eup %2294  ;;  %2308 = vpow2.f32 %v1372_v9  ;;  %v1042_v53 = vmul.f32 1.442695, %v3813_v58  ;;  %v965_v9 = vld [vmem:[#allocation4 + $0x18] sm:$0xff]  ;;  %v968_v58 = vld [vmem:[#allocation4 + $0x30] sm:$0xff] }
 0x2df   :  { %v1366_v26 = vmul.f32 1.442695, %v1308_v24  ;;  %1414 = vadd.xlane.f32.xlu0 %v2295_v14  ;;  %1420 = vadd.xlane.f32.xlu1 %v2293_v41  ;;  %v1376_v13 = vmul.f32 1.442695, %v1313_v40  ;;  %v2297_v57 = vpop.eup %2296 }
 0x2e0   :  { %v1265_v19 = vpop.permute.xlu1 %1264 }
 0x2e1   :  { %2310 = vpow2.f32 %v1366_v26  ;;  %v1310_v63 = vsub.f32 %v3005_v21, %v1265_v19  ;;  %v3817_v19 = vld [vmem:[#allocation7_spill] sm:$0xff] }
 0x2e2   :  { %v2299_v39 = vpop.eup %2298  ;;  %2312 = vpow2.f32 %v1376_v13  ;;  %v967_v13 = vld [vmem:[#allocation4 + $0x28] sm:$0xff] }
 0x2e3   :  { %v1370_v45 = vmul.f32 1.442695, %v1310_v63  ;;  %1418 = vadd.xlane.f32.xlu0 %v2299_v39  ;;  %1424 = vadd.xlane.f32.xlu1 %v2297_v57  ;;  %v2301_v17 = vpop.eup %2300  ;;  %v3818_v57 = vld [vmem:[#allocation9_spill] sm:$0xff] }
 0x2e4   :  { %v1275_v62 = vpop.permute.xlu1 %1274  ;;  %v3819_v63 = vsub.f32 %v3817_v19, %v3818_v57 }
 0x2e5   :  { %2314 = vpow2.f32 %v1370_v45  ;;  %v1312_v23 = vsub.f32 %v3021_v27, %v1275_v62  ;;  %v3802_v27 = vsub.f32 %v3029_v29, %v3032_v33  ;;  %v3806_v29 = vsub.f32 %v3066_v60, %v3083_v8 }
 0x2e6   :  { %v2303_v28 = vpop.eup %2302  ;;  %v3809_v60 = vsub.f32 %v3076_v4, %v3093_v16  ;;  %v3814_v4 = vld [vmem:[#allocation8_spill] sm:$0xff]  ;;  %v3815_v16 = vld [vmem:[#allocation11_spill] sm:$0xff]  ;;  %v1046_v39 = vmul.f32 1.442695, %v3819_v63 }
 0x2e7   :  { %v1374_v50 = vmul.f32 1.442695, %v1312_v23  ;;  %1422 = vadd.xlane.f32.xlu0 %v2303_v28  ;;  %1428 = vadd.xlane.f32.xlu1 %v2301_v17  ;;  %v2305_v30 = vpop.eup %2304  ;;  %v1028_v52 = vmul.f32 1.442695, %v3802_v27  ;;  %v1036_v33 = vmul.f32 1.442695, %v3806_v29  ;;  %v3816_v15 = vsub.f32 %v3814_v4, %v3815_v16 }
 0x2e8   :  { %v1038_v8 = vmul.f32 1.442695, %v3809_v60  ;;  %v3820_v17 = vld [vmem:[#allocation12_spill] sm:$0xff]  ;;  %v3821_v23 = vld [vmem:[#allocation15_spill] sm:$0xff] }
 0x2e9   :  { %2316 = vpow2.f32 %v1374_v50  ;;  %v1048_v36 = vmul.f32 1.442695, %v3816_v15  ;;  %v3822_v28 = vsub.f32 %v3820_v17, %v3821_v23  ;;  %v3839_v4 = vld [vmem:[#allocation27_spill] sm:$0xff]  ;;  %v973_v63 = vld [vmem:[#allocation4 + $0x58] sm:$0xff] }
 0x2ea   :  { %v2307_v61 = vpop.eup %2306  ;;  %2318 = vpow2.f32 %v1028_v52  ;;  %v3826_v52 = vld [vmem:[#allocation16_spill] sm:$0xff] }
 0x2eb   :  { %1426 = vadd.xlane.f32.xlu0 %v2307_v61  ;;  %1432 = vadd.xlane.f32.xlu1 %v2305_v30  ;;  %v2309_v21 = vpop.eup %2308  ;;  %2320 = vpow2.f32 %v1026_v18  ;;  %v1052_v50 = vmul.f32 1.442695, %v3822_v28  ;;  %v3828_v18 = vsub.f32 %v3826_v52, %v3827_v49 }
 0x2ec   :  { %2322 = vpow2.f32 %v1030_v7 }
 0x2ed   :  { %2324 = vpow2.f32 %v1032_v48  ;;  %v1056_v1 = vmul.f32 1.442695, %v3828_v18 }
 0x2ee   :  { %v2311_v3 = vpop.eup %2310  ;;  %2326 = vpow2.f32 %v1036_v33 }
 0x2ef   :  { %1430 = vadd.xlane.f32.xlu0 %v2311_v3  ;;  %1436 = vadd.xlane.f32.xlu1 %v2309_v21  ;;  %v2313_v6 = vpop.eup %2312  ;;  %2328 = vpow2.f32 %v1034_v37  ;;  %v966_v21 = vld [vmem:[#allocation4 + $0x20] sm:$0xff]  ;;  %v3823_v3 = vld [vmem:[#allocation10_spill] sm:$0xff] }
 0x2f0   :  { %2330 = vpow2.f32 %v1040_v35  ;;  %v3829_v37 = vld [vmem:[#allocation14_spill] sm:$0xff] }
 0x2f1   :  { %2332 = vpow2.f32 %v1038_v8  ;;  %v3835_v8 = vld [vmem:[#allocation20_spill] sm:$0xff] }
 0x2f2   :  { %v2315_v25 = vpop.eup %2314  ;;  %2334 = vpow2.f32 %v1044_v0  ;;  %v3837_v0 = vsub.f32 %v3835_v8, %v3836_v54 }
 0x2f3   :  { %1434 = vadd.xlane.f32.xlu0 %v2315_v25  ;;  %1440 = vadd.xlane.f32.xlu1 %v2313_v6  ;;  %2336 = vpow2.f32 %v1042_v53  ;;  %v3824_v6 = vld [vmem:[#allocation13_spill] sm:$0xff] }
 0x2f4   :  { %2338 = vpow2.f32 %v1048_v36  ;;  %v3825_v25 = vsub.f32 %v3823_v3, %v3824_v6 }
 0x2f6   :  { %v2317_v43 = vpop.eup %2316 }
 0x2f7   :  { %1438 = vadd.xlane.f32.xlu0 %v2317_v43  ;;  %v2319_v44 = vpop.eup %2318  ;;  %v1050_v43 = vmul.f32 1.442695, %v3825_v25  ;;  %v1543_v25 = vld [vmem:[#allocation3 + $0x8] sm:$0xff] }
 0x2f8   :  { %v1091_v42 = vmul.f32 %v2319_v44, %v963_v47  ;;  %v2321_v34 = vpop.eup %2320  ;;  %v3830_v44 = vld [vmem:[#allocation17_spill] sm:$0xff] }
 0x2f9   :  { %v2323_v11 = vpop.eup %2322  ;;  %v1090_v20 = vmul.f32 %v2321_v34, %v962_v5  ;;  %v3831_v47 = vsub.f32 %v3829_v37, %v3830_v44  ;;  %v975_v37 = vld [vmem:[#allocation4 + $0x68] sm:$0xff]  ;;  %v972_v44 = vld [vmem:[#allocation4 + $0x50] sm:$0xff] }
 0x2fa   :  { %v2325_v22 = vpop.eup %2324  ;;  %v1092_v31 = vmul.f32 %v2323_v11, %v964_v10  ;;  %v1060_v11 = vmul.f32 1.442695, %v3837_v0 }
 0x2fb   :  { %v1093_v12 = vmul.f32 %v2325_v22, %v965_v9  ;;  %v2327_v40 = vpop.eup %2326  ;;  %v1054_v46 = vmul.f32 1.442695, %v3831_v47  ;;  %v3838_v9 = vld [vmem:[#allocation24_spill] sm:$0xff] }
 0x2fc   :  { %v2329_v30 = vpop.eup %2328  ;;  %v1095_v61 = vmul.f32 %v2327_v40, %v967_v13  ;;  %v3840_v16 = vsub.f32 %v3838_v9, %v3839_v4  ;;  %v3841_v40 = vld [vmem:[#allocation22_spill] sm:$0xff]  ;;  %v3857_v4 = vld [vmem:[#allocation37_spill] sm:$0xff] }
 0x2fd   :  { %v1094_v32 = vmul.f32 %v2329_v30, %v966_v21  ;;  %v2331_v29 = vpop.eup %2330  ;;  %v3848_v21 = vld [vmem:[#allocation31_spill] sm:$0xff]  ;;  %v3856_v9 = vld [vmem:[#allocation34_spill] sm:$0xff] }
 0x2fe   :  { %v2333_v60 = vpop.eup %2332  ;;  %v1064_v15 = vmul.f32 1.442695, %v3840_v16  ;;  %v3858_v16 = vsub.f32 %v3856_v9, %v3857_v4 }
 0x2ff   :  { %v2335_v22 = vpop.eup %2334 }
 0x338   :  { %v1381_v56 = vpop.xlane.xlu0 %1380 }
 0x339   :  { %v1443_v55 = vadd.f32 %v1381_v56, %v1091_v42  ;;  %v3832_v42 = vld [vmem:[#allocation18_spill] sm:$0xff]  ;;  %v3833_v56 = vld [vmem:[#allocation21_spill] sm:$0xff] }
 0x33a   :  { %v3834_v34 = vsub.f32 %v3832_v42, %v3833_v56  ;;  %v3853_v56 = vld [vmem:[#allocation32_spill] sm:$0xff] }
 0x33b   :  { %1476 = vst.msk [vmem:[#allocation4 + $0x8] sm:$0xff] %vm453_vm1, %v1443_v55 }
 0x33c   :  { %v1379_v59 = vpop.xlane.xlu1 %1378  ;;  %v1058_v55 = vmul.f32 1.442695, %v3834_v34  ;;  %v3854_v34 = vld [vmem:[#allocation35_spill] sm:$0xff] }
 0x33d   :  { %v1442_v41 = vadd.f32 %v1379_v59, %v1090_v20  ;;  %v1097_v20 = vmul.f32 %v2331_v29, %v969_v2  ;;  %v2337_v59 = vpop.eup %2336 }
 0x33e   :  { %v2339_v36 = vpop.eup %2338 }
 0x33f   :  { %1475 = vst.msk [vmem:[#allocation4] sm:$0xff] %vm453_vm1, %v1442_v41  ;;  %v1099_v41 = vmul.f32 %v2335_v22, %v971_v38  ;;  %v1101_v52 = vmul.f32 %v2339_v36, %v973_v63 }
 0x340   :  { %v1383_v24 = vpop.xlane.xlu0 %1382 }
 0x341   :  { %v1385_v14 = vpop.xlane.xlu1 %1384  ;;  %v1444_v26 = vadd.f32 %v1383_v24, %v1092_v31  ;;  %v1096_v31 = vmul.f32 %v2333_v60, %v968_v58  ;;  %v977_v58 = vld [vmem:[#allocation4 + $0x78] sm:$0xff] }
 0x342   :  { %v1445_v45 = vadd.f32 %v1385_v14, %v1093_v12  ;;  %v1575_v62 = vld [vmem:[#allocation4 + $0x8] sm:$0xff]  ;;  %v3842_v14 = vld [vmem:[#allocation25_spill] sm:$0xff] }
 0x343   :  { %1477 = vst.msk [vmem:[#allocation4 + $0x10] sm:$0xff] %vm453_vm1, %v1444_v26  ;;  %2340 = vlog2.f32 %v1575_v62  ;;  %v3843_v26 = vsub.f32 %v3841_v40, %v3842_v14  ;;  %v3845_v62 = vld [vmem:[#allocation29_spill] sm:$0xff]  ;;  %v3859_v40 = vld [vmem:[#allocation36_spill] sm:$0xff]  ;;  %v3860_v14 = vld [vmem:[#allocation39_spill] sm:$0xff] }
 0x344   :  { %1478 = vst.msk [vmem:[#allocation4 + $0x18] sm:$0xff] %vm453_vm1, %v1445_v45  ;;  %2342 = vpow2.f32 %v1046_v39  ;;  %v970_v39 = vld [vmem:[#allocation4 + $0x40] sm:$0xff]  ;;  %v3844_v45 = vld [vmem:[#allocation26_spill] sm:$0xff] }
 0x345   :  { %v1389_v27 = vpop.xlane.xlu1 %1388  ;;  %2344 = vpow2.f32 %v1052_v50  ;;  %v1062_v13 = vmul.f32 1.442695, %v3843_v26  ;;  %v3846_v17 = vsub.f32 %v3844_v45, %v3845_v62  ;;  %v1098_v49 = vmul.f32 %v2337_v59, %v970_v39 }
 0x346   :  { %v1447_v7 = vadd.f32 %v1389_v27, %v1095_v61  ;;  %v1574_v48 = vld [vmem:[#allocation4] sm:$0xff]  ;;  %v3847_v61 = vld [vmem:[#allocation28_spill] sm:$0xff]  ;;  %v3861_v26 = vsub.f32 %v3859_v40, %v3860_v14  ;;  %v3871_v40 = vld [vmem:[#allocation42_spill] sm:$0xff] }
 0x347   :  { %2346 = vlog2.f32 %v1574_v48  ;;  %v1066_v23 = vmul.f32 1.442695, %v3846_v17  ;;  %v3849_v3 = vsub.f32 %v3847_v61, %v3848_v21  ;;  %v1545_v17 = vld [vmem:[#allocation3 + $0x18] sm:$0xff]  ;;  %v979_v21 = vld [vmem:[#allocation4 + $0x88] sm:$0xff]  ;;  %v3872_v14 = vld [vmem:[#allocation45_spill] sm:$0xff] }
 0x348   :  { %1480 = vst.msk [vmem:[#allocation4 + $0x28] sm:$0xff] %vm453_vm1, %v1447_v7  ;;  %v1387_v33 = vpop.xlane.xlu0 %1386  ;;  %2348 = vpow2.f32 %v1050_v43  ;;  %v3850_v7 = vld [vmem:[#allocation30_spill] sm:$0xff] }
 0x349   :  { %v1446_v35 = vadd.f32 %v1387_v33, %v1094_v32  ;;  %2350 = vpow2.f32 %v1056_v1  ;;  %v1068_v6 = vmul.f32 1.442695, %v3849_v3  ;;  %v3851_v32 = vld [vmem:[#allocation33_spill] sm:$0xff]  ;;  %v976_v3 = vld [vmem:[#allocation4 + $0x70] sm:$0xff] }
 0x34a   :  { %v1576_v5 = vld [vmem:[#allocation4 + $0x10] sm:$0xff]  ;;  %v3852_v48 = vsub.f32 %v3850_v7, %v3851_v32 }
 0x34b   :  { %1479 = vst.msk [vmem:[#allocation4 + $0x20] sm:$0xff] %vm453_vm1, %v1446_v35  ;;  %v1577_v10 = vld [vmem:[#allocation4 + $0x18] sm:$0xff]  ;;  %2352 = vlog2.f32 %v1576_v5  ;;  %v3866_v7 = vld [vmem:[#allocation43_spill] sm:$0xff] }
 0x34c   :  { %v1393_v51 = vpop.xlane.xlu1 %1392  ;;  %2354 = vlog2.f32 %v1577_v10  ;;  %v1070_v29 = vmul.f32 1.442695, %v3852_v48 }
 0x34d   :  { %2356 = vpow2.f32 %v1054_v46  ;;  %v1449_v53 = vadd.f32 %v1393_v51, %v1097_v20  ;;  %v1542_v20 = vld [vmem:[#allocation3] sm:$0xff] }
 0x34e   :  { %2358 = vpow2.f32 %v1058_v55  ;;  %v3855_v55 = vsub.f32 %v3853_v56, %v3854_v34 }
 0x34f   :  { %2360 = vpow2.f32 %v1060_v11  ;;  %1482 = vst.msk [vmem:[#allocation4 + $0x38] sm:$0xff] %vm453_vm1, %v1449_v53  ;;  %v1579_v12 = vld [vmem:[#allocation4 + $0x28] sm:$0xff]  ;;  %v974_v53 = vld [vmem:[#allocation4 + $0x60] sm:$0xff] }
 0x350   :  { %v2341_v24 = vpop.eup %2340  ;;  %v1397_v19 = vpop.xlane.xlu1 %1396  ;;  %2362 = vlog2.f32 %v1579_v12  ;;  %v1072_v5 = vmul.f32 1.442695, %v3855_v55  ;;  %v981_v55 = vld [vmem:[#allocation4 + $0x98] sm:$0xff] }
 0x351   :  { %v1391_v57 = vpop.xlane.xlu0 %1390  ;;  %v1451_v28 = vadd.f32 %v1397_v19, %v1099_v41  ;;  %v1609_v30 = vmul.f32 0.6931472, %v2341_v24  ;;  %2364 = vpow2.f32 %v1064_v15  ;;  %v2343_v27 = vpop.eup %2342  ;;  %v1074_v15 = vmul.f32 1.442695, %v3858_v16 }
 0x352   :  { %v1448_v50 = vadd.f32 %v1391_v57, %v1096_v31  ;;  %v1578_v43 = vld [vmem:[#allocation4 + $0x20] sm:$0xff]  ;;  %v2345_v1 = vpop.eup %2344  ;;  %v1100_v11 = vmul.f32 %v2343_v27, %v972_v44  ;;  %v1544_v31 = vld [vmem:[#allocation3 + $0x10] sm:$0xff] }
 0x353   :  { %1484 = vst.msk [vmem:[#allocation4 + $0x48] sm:$0xff] %vm453_vm1, %v1451_v28  ;;  %v1671_v18 = vadd.f32 %v1609_v30, %v1543_v25  ;;  %2366 = vlog2.f32 %v1578_v43  ;;  %v1103_v0 = vmul.f32 %v2345_v1, %v975_v37  ;;  %v3862_v25 = vld [vmem:[#allocation38_spill] sm:$0xff]  ;;  %v3863_v43 = vld [vmem:[#allocation41_spill] sm:$0xff]  ;;  %v3865_v1 = vld [vmem:[#allocation40_spill] sm:$0xff] }
 0x354   :  { %1481 = vst.msk [vmem:[#allocation4 + $0x30] sm:$0xff] %vm453_vm1, %v1448_v50  ;;  %2368 = vpow2.f32 %v1062_v13  ;;  %v1401_v33 = vpop.xlane.xlu1 %1400  ;;  %v2347_v47 = vpop.eup %2346  ;;  %v1076_v13 = vmul.f32 1.442695, %v3861_v26  ;;  %v3864_v27 = vsub.f32 %v3862_v25, %v3863_v43  ;;  %v3867_v32 = vsub.f32 %v3865_v1, %v3866_v7  ;;  %v1551_v7 = vld [vmem:[#allocation3 + $0x48] sm:$0xff] }
 0x355   :  { %v1395_v2 = vpop.xlane.xlu0 %1394  ;;  %2370 = vpow2.f32 %v1066_v23  ;;  %v1453_v46 = vadd.f32 %v1401_v33, %v1101_v52  ;;  %1741 = vperm.xlu1 %2252, %v1671_v18   ;;  %v2349_v42 = vpop.eup %2348  ;;  %v1607_v60 = vmul.f32 0.6931472, %v2347_v47  ;;  %v3873_v26 = vsub.f32 %v3871_v40, %v3872_v14 }
 0x356   :  { %v1450_v35 = vadd.f32 %v1395_v2, %v1098_v49  ;;  %2372 = vpow2.f32 %v1068_v6  ;;  %v1581_v8 = vld [vmem:[#allocation4 + $0x38] sm:$0xff]  ;;  %v2351_v54 = vpop.eup %2350  ;;  %v1102_v62 = vmul.f32 %v2349_v42, %v974_v53  ;;  %v1078_v52 = vmul.f32 1.442695, %v3864_v27 }
 0x357   :  { %1486 = vst.msk [vmem:[#allocation4 + $0x58] sm:$0xff] %vm453_vm1, %v1453_v46  ;;  %2374 = vlog2.f32 %v1581_v8  ;;  %v1670_v38 = vadd.f32 %v1607_v60, %v1542_v20  ;;  %v1105_v45 = vmul.f32 %v2351_v54, %v977_v58  ;;  %v1080_v48 = vmul.f32 1.442695, %v3867_v32  ;;  %v1547_v46 = vld [vmem:[#allocation3 + $0x28] sm:$0xff]  ;;  %v3868_v20 = vld [vmem:[#allocation44_spill] sm:$0xff] }
 0x358   :  { %1483 = vst.msk [vmem:[#allocation4 + $0x40] sm:$0xff] %vm453_vm1, %v1450_v35  ;;  %v2353_v10 = vpop.eup %2352  ;;  %2376 = vpow2.f32 %v1070_v29  ;;  %v1405_v22 = vpop.xlane.xlu1 %1404  ;;  %v985_v27 = vld [vmem:[#allocation4 + $0xb8] sm:$0xff] }
 0x359   :  { %v1399_v51 = vpop.xlane.xlu0 %1398  ;;  %v2355_v59 = vpop.eup %2354  ;;  %v1455_v36 = vadd.f32 %v1405_v22, %v1103_v0  ;;  %v1611_v12 = vmul.f32 0.6931472, %v2353_v10  ;;  %2378 = vpow2.f32 %v1072_v5  ;;  %1736 = vperm.xlu0 %2253, %v1670_v38   ;;  %v978_v5 = vld [vmem:[#allocation4 + $0x80] sm:$0xff]  ;;  %v3869_v10 = vld [vmem:[#allocation47_spill] sm:$0xff] }
 0x35a   :  { %v1452_v41 = vadd.f32 %v1399_v51, %v1100_v11  ;;  %v2357_v24 = vpop.eup %2356  ;;  %v1613_v19 = vmul.f32 0.6931472, %v2355_v59  ;;  %v1583_v57 = vld [vmem:[#allocation4 + $0x48] sm:$0xff]  ;;  %v3870_v22 = vsub.f32 %v3868_v20, %v3869_v10  ;;  %v1546_v38 = vld [vmem:[#allocation3 + $0x20] sm:$0xff]  ;;  %v984_v20 = vld [vmem:[#allocation4 + $0xb0] sm:$0xff] }
 0x35b   :  { %v1580_v63 = vld [vmem:[#allocation4 + $0x30] sm:$0xff]  ;;  %v2359_v39 = vpop.eup %2358  ;;  %1488 = vst.msk [vmem:[#allocation4 + $0x68] sm:$0xff] %vm453_vm1, %v1455_v36  ;;  %v1672_v23 = vadd.f32 %v1611_v12, %v1544_v31  ;;  %2380 = vlog2.f32 %v1583_v57  ;;  %v1104_v47 = vmul.f32 %v2357_v24, %v976_v3  ;;  %v983_v31 = vld [vmem:[#allocation4 + $0xa8] sm:$0xff] }
 0x35c   :  { %1485 = vst.msk [vmem:[#allocation4 + $0x50] sm:$0xff] %vm453_vm1, %v1452_v41  ;;  %v2361_v28 = vpop.eup %2360  ;;  %v1409_v50 = vpop.xlane.xlu1 %1408  ;;  %v1673_v61 = vadd.f32 %v1613_v19, %v1545_v17  ;;  %2382 = vlog2.f32 %v1580_v63  ;;  %v1084_v51 = vmul.f32 1.442695, %v3870_v22  ;;  %v1106_v4 = vmul.f32 %v2359_v39, %v978_v5  ;;  %v980_v12 = vld [vmem:[#allocation4 + $0x90] sm:$0xff]  ;;  %v3874_v39 = vld [vmem:[#allocation48_spill] sm:$0xff] }
 0x35d   :  { %v1403_v30 = vpop.xlane.xlu0 %1402  ;;  %v2363_v6 = vpop.eup %2362  ;;  %2384 = vpow2.f32 %v1074_v15  ;;  %v1457_v49 = vadd.f32 %v1409_v50, %v1105_v45  ;;  %1746 = vperm.xlu1 %2252, %v1672_v23   ;;  %v1107_v44 = vmul.f32 %v2361_v28, %v979_v21  ;;  %v3875_v45 = vld [vmem:[#allocation50_spill] sm:$0xff]  ;;  %v1549_v23 = vld [vmem:[#allocation3 + $0x38] sm:$0xff] }
 0x35e   :  { %v1454_v18 = vadd.f32 %v1403_v30, %v1102_v62  ;;  %2386 = vpow2.f32 %v1076_v13  ;;  %1751 = vperm.xlu0 %2253, %v1673_v61   ;;  %v1617_v29 = vmul.f32 0.6931472, %v2363_v6  ;;  %v1585_v33 = vld [vmem:[#allocation4 + $0x58] sm:$0xff]  ;;  %v2365_v37 = vpop.eup %2364  ;;  %v1082_v13 = vmul.f32 1.442695, %v3873_v26 }
 0x35f   :  { %v1582_v2 = vld [vmem:[#allocation4 + $0x40] sm:$0xff]  ;;  %1490 = vst.msk [vmem:[#allocation4 + $0x78] sm:$0xff] %vm453_vm1, %v1457_v49  ;;  %2388 = vlog2.f32 %v1585_v33  ;;  %v1109_v9 = vmul.f32 %v2365_v37, %v981_v55  ;;  %v3876_v62 = vsub.f32 %v3874_v39, %v3875_v45  ;;  %v1548_v55 = vld [vmem:[#allocation3 + $0x30] sm:$0xff]  ;;  %v989_v26 = vld [vmem:[#allocation4 + $0xd8] sm:$0xff] }
 0x360   :  { %1487 = vst.msk [vmem:[#allocation4 + $0x60] sm:$0xff] %vm453_vm1, %v1454_v18  ;;  %v2367_v35 = vpop.eup %2366  ;;  %v1413_v42 = vpop.xlane.xlu1 %1412  ;;  %v1675_v34 = vadd.f32 %v1617_v29, %v1547_v46  ;;  %2390 = vlog2.f32 %v1582_v2  ;;  %v3877_v29 = vld [vmem:[#allocation46_spill] sm:$0xff]  ;;  %v3878_v33 = vld [vmem:[#allocation49_spill] sm:$0xff] }
 0x361   :  { %v1407_v56 = vpop.xlane.xlu0 %1406  ;;  %v2369_v60 = vpop.eup %2368  ;;  %2392 = vpow2.f32 %v1078_v52  ;;  %v1459_v8 = vadd.f32 %v1413_v42, %v1107_v44  ;;  %v1615_v0 = vmul.f32 0.6931472, %v2367_v35  ;;  %v1088_v17 = vmul.f32 1.442695, %v3876_v62  ;;  %v982_v52 = vld [vmem:[#allocation4 + $0xa0] sm:$0xff]  ;;  %v1555_v45 = vld [vmem:[#allocation3 + $0x68] sm:$0xff] }
 0x362   :  { %v1456_v54 = vadd.f32 %v1407_v56, %v1104_v47  ;;  %v2371_v11 = vpop.eup %2370  ;;  %2394 = vpow2.f32 %v1080_v48  ;;  %1761 = vperm.xlu0 %2253, %v1675_v34   ;;  %v1587_v58 = vld [vmem:[#allocation4 + $0x68] sm:$0xff]  ;;  %v1108_v21 = vmul.f32 %v2369_v60, %v980_v12  ;;  %v3879_v2 = vsub.f32 %v3877_v29, %v3878_v33 }
 0x363   :  { %v1584_v53 = vld [vmem:[#allocation4 + $0x50] sm:$0xff]  ;;  %v2373_v59 = vpop.eup %2372  ;;  %1492 = vst.msk [vmem:[#allocation4 + $0x88] sm:$0xff] %vm453_vm1, %v1459_v8  ;;  %v1674_v16 = vadd.f32 %v1615_v0, %v1546_v38  ;;  %2396 = vlog2.f32 %v1587_v58  ;;  %v1110_v56 = vmul.f32 %v2371_v11, %v982_v52  ;;  %v987_v0 = vld [vmem:[#allocation4 + $0xc8] sm:$0xff] }
 0x364   :  { %1489 = vst.msk [vmem:[#allocation4 + $0x70] sm:$0xff] %vm453_vm1, %v1456_v54  ;;  %v2375_v15 = vpop.eup %2374  ;;  %v1417_v36 = vpop.xlane.xlu1 %1416  ;;  %2398 = vlog2.f32 %v1584_v53  ;;  %v1111_v61 = vmul.f32 %v2373_v59, %v983_v31  ;;  %v1086_v37 = vmul.f32 1.442695, %v3879_v2  ;;  %v1553_v53 = vld [vmem:[#allocation3 + $0x58] sm:$0xff] }
 0x365   :  { %v1411_v41 = vpop.xlane.xlu0 %1410  ;;  %v3485_v24 = vpop.eup %2376  ;;  %v1461_v19 = vadd.f32 %v1417_v36, %v1109_v9  ;;  %1756 = vperm.xlu1 %2252, %v1674_v16   ;;  %v1621_v63 = vmul.f32 0.6931472, %v2375_v15  ;;  %2400 = vpow2.f32 %v1084_v51 }
 0x366   :  { %v1458_v57 = vadd.f32 %v1411_v41, %v1106_v4  ;;  %v1589_v28 = vld [vmem:[#allocation4 + $0x78] sm:$0xff]  ;;  %v2379_v30 = vpop.eup %2378  ;;  %v1112_v15 = vmul.f32 %v3485_v24, %v984_v20  ;;  %v1550_v41 = vld [vmem:[#allocation3 + $0x40] sm:$0xff]  ;;  %v1559_v20 = vld [vmem:[#allocation3 + $0x88] sm:$0xff] }
 0x367   :  { %v1586_v50 = vld [vmem:[#allocation4 + $0x60] sm:$0xff]  ;;  %1494 = vst.msk [vmem:[#allocation4 + $0x98] sm:$0xff] %vm453_vm1, %v1461_v19  ;;  %v1677_v3 = vadd.f32 %v1621_v63, %v1549_v23  ;;  %2402 = vlog2.f32 %v1589_v28  ;;  %v1113_v42 = vmul.f32 %v2379_v30, %v985_v27  ;;  %v988_v27 = vld [vmem:[#allocation4 + $0xd0] sm:$0xff] }
 0x368   :  { %1491 = vst.msk [vmem:[#allocation4 + $0x80] sm:$0xff] %vm453_vm1, %v1458_v57  ;;  %v2381_v6 = vpop.eup %2380  ;;  %v1421_v25 = vpop.xlane.xlu1 %1420  ;;  %2404 = vlog2.f32 %v1586_v50 }
 0x369   :  { %v1415_v43 = vpop.xlane.xlu0 %1414  ;;  %v2383_v49 = vpop.eup %2382  ;;  %2406 = vpow2.f32 %v1082_v13  ;;  %v1463_v18 = vadd.f32 %v1421_v25, %v1111_v61  ;;  %1771 = vperm.xlu0 %2253, %v1677_v3   ;;  %v1625_v32 = vmul.f32 0.6931472, %v2381_v6  ;;  %v986_v13 = vld [vmem:[#allocation4 + $0xc0] sm:$0xff]  ;;  %v1552_v61 = vld [vmem:[#allocation3 + $0x50] sm:$0xff] }
 0x36a   :  { %v1460_v1 = vadd.f32 %v1415_v43, %v1108_v21  ;;  %v2385_v48 = vpop.eup %2384  ;;  %2408 = vpow2.f32 %v1088_v17  ;;  %v1619_v44 = vmul.f32 0.6931472, %v2383_v49  ;;  %v1591_v47 = vld [vmem:[#allocation4 + $0x88] sm:$0xff] }
 0x36b   :  { %v1588_v46 = vld [vmem:[#allocation4 + $0x70] sm:$0xff]  ;;  %v2387_v35 = vpop.eup %2386  ;;  %1496 = vst.msk [vmem:[#allocation4 + $0xa8] sm:$0xff] %vm453_vm1, %v1463_v18  ;;  %v1679_v34 = vadd.f32 %v1625_v32, %v1551_v7  ;;  %2410 = vlog2.f32 %v1591_v47  ;;  %v1114_v50 = vmul.f32 %v2385_v48, %v986_v13  ;;  %v991_v43 = vld [vmem:[#allocation4 + $0xe8] sm:$0xff]  ;;  %v1557_v32 = vld [vmem:[#allocation3 + $0x78] sm:$0xff] }
 0x36c   :  { %1493 = vst.msk [vmem:[#allocation4 + $0x90] sm:$0xff] %vm453_vm1, %v1460_v1  ;;  %v2389_v5 = vpop.eup %2388  ;;  %v1425_v60 = vpop.xlane.xlu1 %1424  ;;  %v1676_v54 = vadd.f32 %v1619_v44, %v1548_v55  ;;  %2412 = vlog2.f32 %v1588_v46  ;;  %v1115_v16 = vmul.f32 %v2387_v35, %v987_v0  ;;  %v1554_v46 = vld [vmem:[#allocation3 + $0x60] sm:$0xff]  ;;  %v993_v55 = vld [vmem:[#allocation4 + $0xf8] sm:$0xff] }
 0x36d   :  { %v1419_v8 = vpop.xlane.xlu0 %1418  ;;  %v2391_v10 = vpop.eup %2390  ;;  %v1465_v22 = vadd.f32 %v1425_v60, %v1113_v42  ;;  %1781 = vperm.xlu0 %2253, %v1679_v34   ;;  %v1629_v38 = vmul.f32 0.6931472, %v2389_v5  ;;  %2414 = vpow2.f32 %v1086_v37  ;;  %v990_v5 = vld [vmem:[#allocation4 + $0xe0] sm:$0xff] }
 0x36e   :  { %v1462_v51 = vadd.f32 %v1419_v8, %v1110_v56  ;;  %v2393_v58 = vpop.eup %2392  ;;  %1766 = vperm.xlu1 %2252, %v1676_v54   ;;  %v1623_v11 = vmul.f32 0.6931472, %v2391_v10  ;;  %v1593_v59 = vld [vmem:[#allocation4 + $0x98] sm:$0xff] }
 0x36f   :  { %v1590_v9 = vld [vmem:[#allocation4 + $0x80] sm:$0xff]  ;;  %v2395_v4 = vpop.eup %2394  ;;  %1498 = vst.msk [vmem:[#allocation4 + $0xb8] sm:$0xff] %vm453_vm1, %v1465_v22  ;;  %v1681_v36 = vadd.f32 %v1629_v38, %v1553_v53  ;;  %2416 = vlog2.f32 %v1593_v59  ;;  %v1116_v44 = vmul.f32 %v2393_v58, %v988_v27  ;;  %v1556_v59 = vld [vmem:[#allocation3 + $0x70] sm:$0xff] }
 0x370   :  { %1495 = vst.msk [vmem:[#allocation4 + $0xa0] sm:$0xff] %vm453_vm1, %v1462_v51  ;;  %v2397_v31 = vpop.eup %2396  ;;  %v1429_v12 = vpop.xlane.xlu1 %1428  ;;  %v1678_v14 = vadd.f32 %v1623_v11, %v1550_v41  ;;  %2418 = vlog2.f32 %v1590_v9  ;;  %v1117_v28 = vmul.f32 %v2395_v4, %v989_v26 }
 0x371   :  { %v1423_v40 = vpop.xlane.xlu0 %1422  ;;  %v2399_v19 = vpop.eup %2398  ;;  %v1467_v57 = vadd.f32 %v1429_v12, %v1115_v16  ;;  %1791 = vperm.xlu0 %2253, %v1681_v36   ;;  %v1633_v39 = vmul.f32 0.6931472, %v2397_v31  ;;  %v992_v36 = vld [vmem:[#allocation4 + $0xf0] sm:$0xff] }
 0x372   :  { %v1464_v63 = vadd.f32 %v1423_v40, %v1112_v15  ;;  %1776 = vperm.xlu1 %2252, %v1678_v14   ;;  %v1627_v62 = vmul.f32 0.6931472, %v2399_v19  ;;  %v1595_v17 = vld [vmem:[#allocation4 + $0xa8] sm:$0xff]  ;;  %v2401_v23 = vpop.eup %2400  ;;  %v1561_v14 = vld [vmem:[#allocation3 + $0x98] sm:$0xff] }
 0x373   :  { %v1592_v24 = vld [vmem:[#allocation4 + $0x90] sm:$0xff]  ;;  %1500 = vst.msk [vmem:[#allocation4 + $0xc8] sm:$0xff] %vm453_vm1, %v1467_v57  ;;  %v1683_v30 = vadd.f32 %v1633_v39, %v1555_v45  ;;  %2420 = vlog2.f32 %v1595_v17  ;;  %v1119_v37 = vmul.f32 %v2401_v23, %v991_v43  ;;  %v1558_v39 = vld [vmem:[#allocation3 + $0x80] sm:$0xff] }
 0x374   :  { %1497 = vst.msk [vmem:[#allocation4 + $0xb0] sm:$0xff] %vm453_vm1, %v1464_v63  ;;  %v2403_v21 = vpop.eup %2402  ;;  %v1433_v3 = vpop.xlane.xlu1 %1432  ;;  %v1680_v25 = vadd.f32 %v1627_v62, %v1552_v61  ;;  %2422 = vlog2.f32 %v1592_v24 }
 0x375   :  { %v1427_v6 = vpop.xlane.xlu0 %1426  ;;  %v2405_v52 = vpop.eup %2404  ;;  %v1469_v49 = vadd.f32 %v1433_v3, %v1117_v28  ;;  %1801 = vperm.xlu0 %2253, %v1683_v30   ;;  %v1637_v1 = vmul.f32 0.6931472, %v2403_v21 }
 0x376   :  { %v1466_v18 = vadd.f32 %v1427_v6, %v1114_v50  ;;  %v2407_v7 = vpop.eup %2406  ;;  %1786 = vperm.xlu1 %2252, %v1680_v25   ;;  %v1631_v29 = vmul.f32 0.6931472, %v2405_v52  ;;  %v1597_v48 = vld [vmem:[#allocation4 + $0xb8] sm:$0xff]  ;;  %v1563_v50 = vld [vmem:[#allocation3 + $0xa8] sm:$0xff]  ;;  %v1560_v6 = vld [vmem:[#allocation3 + $0x90] sm:$0xff] }
 0x377   :  { %v1594_v33 = vld [vmem:[#allocation4 + $0xa0] sm:$0xff]  ;;  %v2409_v2 = vpop.eup %2408  ;;  %1502 = vst.msk [vmem:[#allocation4 + $0xd8] sm:$0xff] %vm453_vm1, %v1469_v49  ;;  %v1685_v47 = vadd.f32 %v1637_v1, %v1557_v32  ;;  %2424 = vlog2.f32 %v1597_v48  ;;  %v1118_v53 = vmul.f32 %v2407_v7, %v990_v5  ;;  %v1565_v49 = vld [vmem:[#allocation3 + $0xb8] sm:$0xff] }
 0x378   :  { %1499 = vst.msk [vmem:[#allocation4 + $0xc0] sm:$0xff] %vm453_vm1, %v1466_v18  ;;  %v2411_v35 = vpop.eup %2410  ;;  %v1437_v42 = vpop.xlane.xlu1 %1436  ;;  %v1682_v34 = vadd.f32 %v1631_v29, %v1554_v46  ;;  %2426 = vlog2.f32 %v1594_v33  ;;  %v1121_v58 = vmul.f32 %v2409_v2, %v993_v55  ;;  %v1562_v29 = vld [vmem:[#allocation3 + $0xa0] sm:$0xff] }
 0x379   :  { %v1431_v56 = vpop.xlane.xlu0 %1430  ;;  %v2413_v60 = vpop.eup %2412  ;;  %v1471_v8 = vadd.f32 %v1437_v42, %v1119_v37  ;;  %1811 = vperm.xlu0 %2253, %v1685_v47   ;;  %v1641_v0 = vmul.f32 0.6931472, %v2411_v35  ;;  %v1564_v42 = vld [vmem:[#allocation3 + $0xb0] sm:$0xff] }
 0x37a   :  { %v1468_v54 = vadd.f32 %v1431_v56, %v1116_v44  ;;  %1796 = vperm.xlu1 %2252, %v1682_v34   ;;  %v1635_v10 = vmul.f32 0.6931472, %v2413_v60  ;;  %v1599_v22 = vld [vmem:[#allocation4 + $0xc8] sm:$0xff]  ;;  %v2415_v38 = vpop.eup %2414  ;;  %v1569_v60 = vld [vmem:[#allocation3 + $0xd8] sm:$0xff] }
 0x37b   :  { %v1596_v51 = vld [vmem:[#allocation4 + $0xb0] sm:$0xff]  ;;  %1504 = vst.msk [vmem:[#allocation4 + $0xe8] sm:$0xff] %vm453_vm1, %v1471_v8  ;;  %v1687_v11 = vadd.f32 %v1641_v0, %v1559_v20  ;;  %2428 = vlog2.f32 %v1599_v22  ;;  %v1120_v57 = vmul.f32 %v2415_v38, %v992_v36  ;;  %v1567_v44 = vld [vmem:[#allocation3 + $0xc8] sm:$0xff]  ;;  %v1566_v0 = vld [vmem:[#allocation3 + $0xc0] sm:$0xff] }
 0x37c   :  { %1501 = vst.msk [vmem:[#allocation4 + $0xd0] sm:$0xff] %vm453_vm1, %v1468_v54  ;;  %v2417_v9 = vpop.eup %2416  ;;  %v1441_v4 = vpop.xlane.xlu1 %1440  ;;  %v1684_v15 = vadd.f32 %v1635_v10, %v1556_v59  ;;  %2430 = vlog2.f32 %v1596_v51  ;;  %v1571_v38 = vld [vmem:[#allocation3 + $0xe8] sm:$0xff] }
 0x37d   :  { %v1435_v16 = vpop.xlane.xlu0 %1434  ;;  %v2419_v41 = vpop.eup %2418  ;;  %v1473_v31 = vadd.f32 %v1441_v4, %v1121_v58  ;;  %1821 = vperm.xlu0 %2253, %v1687_v11   ;;  %v1645_v40 = vmul.f32 0.6931472, %v2417_v9  ;;  %v1568_v11 = vld [vmem:[#allocation3 + $0xd0] sm:$0xff] }
 0x37e   :  { %v1470_v12 = vadd.f32 %v1435_v16, %v1118_v53  ;;  %1806 = vperm.xlu1 %2252, %v1684_v15   ;;  %v1639_v26 = vmul.f32 0.6931472, %v2419_v41  ;;  %v1601_v13 = vld [vmem:[#allocation4 + $0xd8] sm:$0xff] }
 0x37f   :  { %v1598_v19 = vld [vmem:[#allocation4 + $0xc0] sm:$0xff]  ;;  %1506 = vst.msk [vmem:[#allocation4 + $0xf8] sm:$0xff] %vm453_vm1, %v1473_v31  ;;  %v1689_v63 = vadd.f32 %v1645_v40, %v1561_v14  ;;  %2432 = vlog2.f32 %v1601_v13  ;;  %v1573_v15 = vld [vmem:[#allocation3 + $0xf8] sm:$0xff] }
 0x380   :  { %1503 = vst.msk [vmem:[#allocation4 + $0xe0] sm:$0xff] %vm453_vm1, %v1470_v12  ;;  %v2421_v45 = vpop.eup %2420  ;;  %v1686_v17 = vadd.f32 %v1639_v26, %v1558_v39  ;;  %2434 = vlog2.f32 %v1598_v19  ;;  %v1570_v31 = vld [vmem:[#allocation3 + $0xe0] sm:$0xff]  ;;  %v1572_v26 = vld [vmem:[#allocation3 + $0xf0] sm:$0xff]  ;;  %v1703_v19 = vld [vmem:[%s3709_s5 + $0x8] sm:$0xff] }
 0x381   :  { %v1439_v62 = vpop.xlane.xlu0 %1438  ;;  %v2423_v24 = vpop.eup %2422  ;;  %1831 = vperm.xlu0 %2253, %v1689_v63   ;;  %v1649_v28 = vmul.f32 0.6931472, %v2421_v45  ;;  %v1702_v45 = vld [vmem:[%s3709_s5] sm:$0xff] }
 0x382   :  { %v1472_v23 = vadd.f32 %v1439_v62, %v1120_v57  ;;  %1816 = vperm.xlu1 %2252, %v1686_v17   ;;  %v1643_v30 = vmul.f32 0.6931472, %v2423_v24  ;;  %v1603_v61 = vld [vmem:[#allocation4 + $0xe8] sm:$0xff]  ;;  %v1704_v17 = vld [vmem:[%s3709_s5 + $0x10] sm:$0xff] }
 0x383   :  { %v1600_v21 = vld [vmem:[#allocation4 + $0xd0] sm:$0xff]  ;;  %v1691_v3 = vadd.f32 %v1649_v28, %v1563_v50  ;;  %2436 = vlog2.f32 %v1603_v61  ;;  %v1705_v28 = vld [vmem:[%s3709_s5 + $0x18] sm:$0xff]  ;;  %v1707_v61 = vld [vmem:[%s3709_s5 + $0x28] sm:$0xff] }
 0x384   :  { %1505 = vst.msk [vmem:[#allocation4 + $0xf0] sm:$0xff] %vm453_vm1, %v1472_v23  ;;  %v2425_v25 = vpop.eup %2424  ;;  %v1688_v43 = vadd.f32 %v1643_v30, %v1560_v6  ;;  %2438 = vlog2.f32 %v1600_v21  ;;  %v1706_v6 = vld [vmem:[%s3709_s5 + $0x20] sm:$0xff] }
 0x385   :  { %v2427_v27 = vpop.eup %2426  ;;  %1841 = vperm.xlu0 %2253, %v1691_v3   ;;  %v1653_v52 = vmul.f32 0.6931472, %v2425_v25 }
 0x386   :  { %1826 = vperm.xlu1 %2252, %v1688_v43   ;;  %v1647_v18 = vmul.f32 0.6931472, %v2427_v27  ;;  %v1605_v1 = vld [vmem:[#allocation4 + $0xf8] sm:$0xff] }
 0x387   :  { %v1602_v7 = vld [vmem:[#allocation4 + $0xe0] sm:$0xff]  ;;  %v1693_v32 = vadd.f32 %v1653_v52, %v1565_v49  ;;  %2440 = vlog2.f32 %v1605_v1  ;;  %v1709_v27 = vld [vmem:[%s3709_s5 + $0x38] sm:$0xff] }
 0x388   :  { %v2429_v48 = vpop.eup %2428  ;;  %v1690_v33 = vadd.f32 %v1647_v18, %v1562_v29  ;;  %2442 = vlog2.f32 %v1602_v7  ;;  %v1711_v18 = vld [vmem:[%s3709_s5 + $0x48] sm:$0xff]  ;;  %v1708_v7 = vld [vmem:[%s3709_s5 + $0x30] sm:$0xff] }
 0x389   :  { %v2431_v2 = vpop.eup %2430  ;;  %1851 = vperm.xlu0 %2253, %v1693_v32   ;;  %v1657_v37 = vmul.f32 0.6931472, %v2429_v48 }
 0x38a   :  { %1836 = vperm.xlu1 %2252, %v1690_v33   ;;  %v1651_v47 = vmul.f32 0.6931472, %v2431_v2  ;;  %v1713_v33 = vld [vmem:[%s3709_s5 + $0x58] sm:$0xff] }
 0x38b   :  { %v1604_v46 = vld [vmem:[#allocation4 + $0xf0] sm:$0xff]  ;;  %v1695_v35 = vadd.f32 %v1657_v37, %v1567_v44  ;;  %v1710_v37 = vld [vmem:[%s3709_s5 + $0x40] sm:$0xff] }
 0x38c   :  { %2444 = vlog2.f32 %v1604_v46  ;;  %v2433_v56 = vpop.eup %2432  ;;  %v1692_v34 = vadd.f32 %v1651_v47, %v1564_v42 }
 0x38d   :  { %v2435_v55 = vpop.eup %2434  ;;  %1861 = vperm.xlu0 %2253, %v1695_v35   ;;  %v1661_v5 = vmul.f32 0.6931472, %v2433_v56  ;;  %v1715_v35 = vld [vmem:[%s3709_s5 + $0x68] sm:$0xff]  ;;  %v1712_v56 = vld [vmem:[%s3709_s5 + $0x50] sm:$0xff] }
 0x38e   :  { %1846 = vperm.xlu1 %2252, %v1692_v34   ;;  %v1655_v8 = vmul.f32 0.6931472, %v2435_v55 }
 0x38f   :  { %v1697_v54 = vadd.f32 %v1661_v5, %v1569_v60  ;;  %v1717_v60 = vld [vmem:[%s3709_s5 + $0x78] sm:$0xff] }
 0x390   :  { %v2437_v20 = vpop.eup %2436  ;;  %v1694_v10 = vadd.f32 %v1655_v8, %v1566_v0 }
 0x391   :  { %v2439_v22 = vpop.eup %2438  ;;  %1871 = vperm.xlu0 %2253, %v1697_v54   ;;  %v1665_v51 = vmul.f32 0.6931472, %v2437_v20  ;;  %v1714_v54 = vld [vmem:[%s3709_s5 + $0x60] sm:$0xff] }
 0x392   :  { %1856 = vperm.xlu1 %2252, %v1694_v10   ;;  %v1659_v58 = vmul.f32 0.6931472, %v2439_v22  ;;  %v1719_v22 = vld [vmem:[%s3709_s5 + $0x88] sm:$0xff] }
 0x393   :  { %v1699_v53 = vadd.f32 %v1665_v51, %v1571_v38  ;;  %v1716_v38 = vld [vmem:[%s3709_s5 + $0x70] sm:$0xff] }
 0x394   :  { %v2441_v59 = vpop.eup %2440  ;;  %v1696_v9 = vadd.f32 %v1659_v58, %v1568_v11 }
 0x395   :  { %v2443_v4 = vpop.eup %2442  ;;  %1881 = vperm.xlu0 %2253, %v1699_v53   ;;  %v1669_v16 = vmul.f32 0.6931472, %v2441_v59  ;;  %v1721_v59 = vld [vmem:[%s3709_s5 + $0x98] sm:$0xff] }
 0x396   :  { %1866 = vperm.xlu1 %2252, %v1696_v9   ;;  %v1663_v36 = vmul.f32 0.6931472, %v2443_v4  ;;  %v1718_v4 = vld [vmem:[%s3709_s5 + $0x80] sm:$0xff] }
 0x397   :  { %v1701_v41 = vadd.f32 %v1669_v16, %v1573_v15 }
 0x398   :  { %v1698_v40 = vadd.f32 %v1663_v36, %v1570_v31 }
 0x399   :  { %v2445_v12 = vpop.eup %2444  ;;  %1891 = vperm.xlu0 %2253, %v1701_v41   ;;  %v1723_v41 = vld [vmem:[%s3709_s5 + $0xa8] sm:$0xff] }
 0x39a   :  { %v1667_v14 = vmul.f32 0.6931472, %v2445_v12  ;;  %1876 = vperm.xlu1 %2252, %v1698_v40   ;;  %v1720_v12 = vld [vmem:[%s3709_s5 + $0x90] sm:$0xff] }
 0x39c   :  { %v1700_v13 = vadd.f32 %v1667_v14, %v1572_v26 }
 0x39e   :  { %1886 = vperm.xlu1 %2252, %v1700_v13   ;;  %v1725_v13 = vld [vmem:[%s3709_s5 + $0xb8] sm:$0xff] }
 0x3d0   :  { %v1742_v57 = vpop.permute.xlu1 %1741 }
 0x3d1   :  { %v1895_v63 = vsub.f32 %v1703_v19, %v1742_v57  ;;  %v1722_v57 = vld [vmem:[%s3709_s5 + $0xa0] sm:$0xff] }
 0x3d3   :  { %1927 = vst [vmem:[%s3709_s5 + $0x8] sm:$0xff] %v1895_v63 }
 0x3d4   :  { %v1737_v39 = vpop.permute.xlu0 %1736 }
 0x3d5   :  { %v1894_v62 = vsub.f32 %v1702_v45, %v1737_v39 }
 0x3d7   :  { %1926 = vst [vmem:[%s3709_s5] sm:$0xff] %v1894_v62  ;;  %v1727_v62 = vld [vmem:[%s3709_s5 + $0xc8] sm:$0xff] }
 0x3d8   :  { %v1747_v24 = vpop.permute.xlu1 %1746 }
 0x3d9   :  { %v1896_v23 = vsub.f32 %v1704_v17, %v1747_v24  ;;  %v1752_v50 = vpop.permute.xlu0 %1751  ;;  %v1724_v24 = vld [vmem:[%s3709_s5 + $0xb0] sm:$0xff] }
 0x3da   :  { %v1897_v30 = vsub.f32 %v1705_v28, %v1752_v50 }
 0x3db   :  { %1928 = vst [vmem:[%s3709_s5 + $0x10] sm:$0xff] %v1896_v23 }
 0x3dc   :  { %1929 = vst [vmem:[%s3709_s5 + $0x18] sm:$0xff] %v1897_v30  ;;  %v1729_v30 = vld [vmem:[%s3709_s5 + $0xd8] sm:$0xff] }
 0x3dd   :  { %v1762_v21 = vpop.permute.xlu0 %1761 }
 0x3de   :  { %v1899_v3 = vsub.f32 %v1707_v61, %v1762_v21  ;;  %v1726_v21 = vld [vmem:[%s3709_s5 + $0xc0] sm:$0xff] }
 0x3e0   :  { %1931 = vst [vmem:[%s3709_s5 + $0x28] sm:$0xff] %v1899_v3  ;;  %v1757_v25 = vpop.permute.xlu1 %1756 }
 0x3e1   :  { %v1898_v43 = vsub.f32 %v1706_v6, %v1757_v25 }
 0x3e3   :  { %1930 = vst [vmem:[%s3709_s5 + $0x20] sm:$0xff] %v1898_v43  ;;  %v1731_v43 = vld [vmem:[%s3709_s5 + $0xe8] sm:$0xff] }
 0x3e4   :  { %v1772_v52 = vpop.permute.xlu0 %1771 }
 0x3e5   :  { %v1901_v49 = vsub.f32 %v1709_v27, %v1772_v52  ;;  %v1728_v52 = vld [vmem:[%s3709_s5 + $0xd0] sm:$0xff] }
 0x3e7   :  { %1933 = vst [vmem:[%s3709_s5 + $0x38] sm:$0xff] %v1901_v49 }
 0x3e8   :  { %v1782_v1 = vpop.permute.xlu0 %1781 }
 0x3e9   :  { %v1767_v32 = vpop.permute.xlu1 %1766  ;;  %v1903_v29 = vsub.f32 %v1711_v18, %v1782_v1 }
 0x3ea   :  { %v1900_v48 = vsub.f32 %v1708_v7, %v1767_v32  ;;  %v1733_v7 = vld [vmem:[%s3709_s5 + $0xf8] sm:$0xff] }
 0x3eb   :  { %1935 = vst [vmem:[%s3709_s5 + $0x48] sm:$0xff] %v1903_v29  ;;  %v1730_v29 = vld [vmem:[%s3709_s5 + $0xe0] sm:$0xff] }
 0x3ec   :  { %1932 = vst [vmem:[%s3709_s5 + $0x30] sm:$0xff] %v1900_v48  ;;  %v1792_v2 = vpop.permute.xlu0 %1791 }
 0x3ed   :  { %v1777_v44 = vpop.permute.xlu1 %1776  ;;  %v1905_v47 = vsub.f32 %v1713_v33, %v1792_v2 }
 0x3ee   :  { %v1902_v46 = vsub.f32 %v1710_v37, %v1777_v44  ;;  %v1732_v37 = vld [vmem:[%s3709_s5 + $0xf0] sm:$0xff] }
 0x3ef   :  { %1937 = vst [vmem:[%s3709_s5 + $0x58] sm:$0xff] %v1905_v47 }
 0x3f0   :  { %1934 = vst [vmem:[%s3709_s5 + $0x40] sm:$0xff] %v1902_v46  ;;  %v1802_v42 = vpop.permute.xlu0 %1801 }
 0x3f1   :  { %v1787_v34 = vpop.permute.xlu1 %1786  ;;  %v1907_v55 = vsub.f32 %v1715_v35, %v1802_v42 }
 0x3f2   :  { %v1904_v5 = vsub.f32 %v1712_v56, %v1787_v34 }
 0x3f3   :  { %1939 = vst [vmem:[%s3709_s5 + $0x68] sm:$0xff] %v1907_v55 }
 0x3f4   :  { %1936 = vst [vmem:[%s3709_s5 + $0x50] sm:$0xff] %v1904_v5  ;;  %v1812_v8 = vpop.permute.xlu0 %1811 }
 0x3f5   :  { %v1797_v0 = vpop.permute.xlu1 %1796  ;;  %v1909_v20 = vsub.f32 %v1717_v60, %v1812_v8 }
 0x3f6   :  { %v1906_v10 = vsub.f32 %v1714_v54, %v1797_v0 }
 0x3f7   :  { %1941 = vst [vmem:[%s3709_s5 + $0x78] sm:$0xff] %v1909_v20 }
 0x3f8   :  { %1938 = vst [vmem:[%s3709_s5 + $0x60] sm:$0xff] %v1906_v10  ;;  %v1822_v51 = vpop.permute.xlu0 %1821 }
 0x3f9   :  { %v1807_v58 = vpop.permute.xlu1 %1806  ;;  %v1911_v53 = vsub.f32 %v1719_v22, %v1822_v51 }
 0x3fa   :  { %v1908_v11 = vsub.f32 %v1716_v38, %v1807_v58 }
 0x3fb   :  { %1943 = vst [vmem:[%s3709_s5 + $0x88] sm:$0xff] %v1911_v53 }
 0x3fc   :  { %1940 = vst [vmem:[%s3709_s5 + $0x70] sm:$0xff] %v1908_v11  ;;  %v1832_v9 = vpop.permute.xlu0 %1831 }
 0x3fd   :  { %v1817_v16 = vpop.permute.xlu1 %1816  ;;  %v1913_v15 = vsub.f32 %v1721_v59, %v1832_v9 }
 0x3fe   :  { %v1910_v36 = vsub.f32 %v1718_v4, %v1817_v16 }
 0x3ff   :  { %1945 = vst [vmem:[%s3709_s5 + $0x98] sm:$0xff] %v1913_v15 }
 0x400   :  { %1942 = vst [vmem:[%s3709_s5 + $0x80] sm:$0xff] %v1910_v36  ;;  %v1842_v31 = vpop.permute.xlu0 %1841 }
 0x401   :  { %v1827_v40 = vpop.permute.xlu1 %1826  ;;  %v1915_v14 = vsub.f32 %v1723_v41, %v1842_v31 }
 0x402   :  { %v1912_v26 = vsub.f32 %v1720_v12, %v1827_v40 }
 0x403   :  { %1947 = vst [vmem:[%s3709_s5 + $0xa8] sm:$0xff] %v1915_v14 }
 0x404   :  { %1944 = vst [vmem:[%s3709_s5 + $0x90] sm:$0xff] %v1912_v26  ;;  %v1852_v19 = vpop.permute.xlu0 %1851 }
 0x405   :  { %v1837_v63 = vpop.permute.xlu1 %1836  ;;  %v1917_v39 = vsub.f32 %v1725_v13, %v1852_v19 }
 0x406   :  { %v1914_v45 = vsub.f32 %v1722_v57, %v1837_v63 }
 0x407   :  { %1949 = vst [vmem:[%s3709_s5 + $0xb8] sm:$0xff] %v1917_v39 }
 0x408   :  { %1946 = vst [vmem:[%s3709_s5 + $0xa0] sm:$0xff] %v1914_v45  ;;  %v1862_v17 = vpop.permute.xlu0 %1861 }
 0x409   :  { %v1847_v23 = vpop.permute.xlu1 %1846  ;;  %v1919_v28 = vsub.f32 %v1727_v62, %v1862_v17 }
 0x40a   :  { %v1916_v50 = vsub.f32 %v1724_v24, %v1847_v23 }
 0x40b   :  { %1951 = vst [vmem:[%s3709_s5 + $0xc8] sm:$0xff] %v1919_v28 }
 0x40c   :  { %1948 = vst [vmem:[%s3709_s5 + $0xb0] sm:$0xff] %v1916_v50  ;;  %v1872_v61 = vpop.permute.xlu0 %1871 }
 0x40d   :  { %v1857_v3 = vpop.permute.xlu1 %1856  ;;  %v1921_v6 = vsub.f32 %v1729_v30, %v1872_v61 }
 0x40e   :  { %v1918_v25 = vsub.f32 %v1726_v21, %v1857_v3 }
 0x40f   :  { %1953 = vst [vmem:[%s3709_s5 + $0xd8] sm:$0xff] %v1921_v6 }
 0x410   :  { %1950 = vst [vmem:[%s3709_s5 + $0xc0] sm:$0xff] %v1918_v25  ;;  %v1882_v27 = vpop.permute.xlu0 %1881 }
 0x411   :  { %v1867_v49 = vpop.permute.xlu1 %1866  ;;  %v1923_v18 = vsub.f32 %v1731_v43, %v1882_v27 }
 0x412   :  { %v1920_v1 = vsub.f32 %v1728_v52, %v1867_v49 }
 0x413   :  { %1955 = vst [vmem:[%s3709_s5 + $0xe8] sm:$0xff] %v1923_v18 }
 0x414   :  { %1952 = vst [vmem:[%s3709_s5 + $0xd0] sm:$0xff] %v1920_v1  ;;  %v1892_v32 = vpop.permute.xlu0 %1891 }
 0x415   :  { %v1877_v48 = vpop.permute.xlu1 %1876  ;;  %v1925_v33 = vsub.f32 %v1733_v7, %v1892_v32 }
 0x416   :  { %v1922_v2 = vsub.f32 %v1730_v29, %v1877_v48 }
 0x417   :  { %1957 = vst [vmem:[%s3709_s5 + $0xf8] sm:$0xff] %v1925_v33 }
 0x418   :  { %1954 = vst [vmem:[%s3709_s5 + $0xe0] sm:$0xff] %v1922_v2 }
 0x419   :  { %v1887_v44 = vpop.permute.xlu1 %1886 }
 0x41a   :  { %v1924_v47 = vsub.f32 %v1732_v37, %v1887_v44 }
 0x41c   :  { %1956 = vst [vmem:[%s3709_s5 + $0xf0] sm:$0xff] %v1924_v47 }

</bundles_post_ra>
